<compile_context>
chip_gen: v7x
topology: tpu7x:2x2x1
jax: 0.10.0
libtpu: 0.0.40
codegen_flags: <defaults>
</compile_context>

<pallas_src>
import math

import jax
import jax.numpy as jnp
from jax.experimental import pallas as pl
from jax.experimental.pallas import tpu as pltpu

LANE = 128                      # TPU lane width; stored channel dims padded to this
_MAX_TM = 256                   # max rows per tile (multiple of 8)
_MAX_TK = 512                   # max contraction tile (multiple of 128)
_VMEM_LIMIT = 32 * 1024 * 1024  # explicit scoped-VMEM budget (fits v5e/v6e/v7x)


def _round_up(x, m):
    return -(-x // m) * m


# ----------------------- tiled fused matmul (the workhorse) ------------------
# y = x @ w + b  [-> PReLU(alpha)]  [-> residual + res_scale * y]

def _make_mm_kernel(has_prelu, has_res, res_scale):
    def kernel(*refs):
        x_ref, w_ref, b_ref = refs[0], refs[1], refs[2]
        idx = 3
        a_ref = None
        r_ref = None
        if has_prelu:
            a_ref = refs[idx]
            idx += 1
        if has_res:
            r_ref = refs[idx]
            idx += 1
        o_ref, acc_ref = refs[idx], refs[idx + 1]

        k = pl.program_id(2)

        @pl.when(k == 0)
        def _init():
            acc_ref[...] = jnp.zeros_like(acc_ref)

        acc_ref[...] += jnp.dot(x_ref[...], w_ref[...],
                                preferred_element_type=jnp.float32)

        @pl.when(k == pl.num_programs(2) - 1)
        def _epilogue():
            y = acc_ref[...] + b_ref[...]
            if has_prelu:
                y = jnp.where(y >= 0.0, y, y * a_ref[...])
            if has_res:
                y = r_ref[...] + res_scale * y
            o_ref[...] = y.astype(o_ref.dtype)

    return kernel


def fused_matmul(x, w, b, *, alpha=None, residual=None, res_scale=1.0):
    """x:(M,K), w:(K,N), b:(N,).  Optional alpha:(N,), residual:(M,>=N) f32.

    Returns f32 (M, Np) with Np = round_up(N, 128); columns >= N come from the
    zero-padded weight/bias path (exactly zero for bias/PReLU layers)."""
    M, K = x.shape
    _, N = w.shape

    tm = min(_MAX_TM, _round_up(M, 8))
    tk = min(_MAX_TK, _round_up(K, LANE))
    tn = LANE
    Mp = _round_up(M, tm)
    Kp = _round_up(K, tk)
    Np = _round_up(N, tn)

    xb = jnp.pad(x.astype(jnp.bfloat16), ((0, Mp - M), (0, Kp - K)))
    wb = jnp.pad(w.astype(jnp.bfloat16), ((0, Kp - K), (0, Np - N)))
    bb = jnp.pad(b.astype(jnp.float32), (0, Np - N)).reshape(1, Np)

    inputs = [xb, wb, bb]
    in_specs = [
        pl.BlockSpec((tm, tk), lambda i, j, k: (i, k)),
        pl.BlockSpec((tk, tn), lambda i, j, k: (k, j)),
        pl.BlockSpec((1, tn), lambda i, j, k: (0, j)),
    ]
    if alpha is not None:
        ab = jnp.pad(alpha.astype(jnp.float32), (0, Np - N)).reshape(1, Np)
        inputs.append(ab)
        in_specs.append(pl.BlockSpec((1, tn), lambda i, j, k: (0, j)))
    if residual is not None:
        Nr = residual.shape[1]
        rb = jnp.pad(residual.astype(jnp.float32), ((0, Mp - M), (0, Np - Nr)))
        inputs.append(rb)
        in_specs.append(pl.BlockSpec((tm, tn), lambda i, j, k: (i, j)))

    kernel = _make_mm_kernel(alpha is not None, residual is not None,
                             float(res_scale))

    flops = 2 * Mp * Kp * Np
    bytes_accessed = ((Mp * Kp + Kp * Np) * 2
                      + Mp * Np * 4 * (2 if residual is not None else 1)
                      + 2 * Np * 4)

    out = pl.pallas_call(
        kernel,
        out_shape=jax.ShapeDtypeStruct((Mp, Np), jnp.float32),
        grid_spec=pltpu.PrefetchScalarGridSpec(
            num_scalar_prefetch=0,
            grid=(Mp // tm, Np // tn, Kp // tk),
            in_specs=in_specs,
            out_specs=pl.BlockSpec((tm, tn), lambda i, j, k: (i, j)),
            scratch_shapes=[pltpu.VMEM((tm, tn), jnp.float32)],
        ),
        compiler_params=pltpu.CompilerParams(
            dimension_semantics=("parallel", "parallel", "arbitrary"),
            vmem_limit_bytes=_VMEM_LIMIT,
        ),
        cost_estimate=pl.CostEstimate(flops=flops, transcendentals=0,
                                      bytes_accessed=bytes_accessed),
    )(*inputs)
    return out[:M]


# ----------------------- fused FC head (fc0 + res blocks + dis) --------------

def _make_fc_head_kernel(num_res):
    def kernel(*refs):
        feat_ref = refs[0]
        w0_ref, b0_ref, a0_ref = refs[1], refs[2], refs[3]
        idx = 4
        blocks = []
        for _ in range(num_res):
            blocks.append(refs[idx:idx + 5])
            idx += 5
        wd_ref, bd_ref = refs[idx], refs[idx + 1]
        o_ref = refs[idx + 2]

        h = jnp.dot(feat_ref[...], w0_ref[...],
                    preferred_element_type=jnp.float32) + b0_ref[...]
        h = jnp.where(h >= 0.0, h, h * a0_ref[...])
        for (w1_ref, b1_ref, a1_ref, w2_ref, b2_ref) in blocks:
            t = jnp.dot(h.astype(jnp.bfloat16), w1_ref[...],
                        preferred_element_type=jnp.float32) + b1_ref[...]
            t = jnp.where(t >= 0.0, t, t * a1_ref[...])
            h = h + (jnp.dot(t.astype(jnp.bfloat16), w2_ref[...],
                             preferred_element_type=jnp.float32) + b2_ref[...])
        o_ref[...] = jnp.dot(h.astype(jnp.bfloat16), wd_ref[...],
                             preferred_element_type=jnp.float32) + bd_ref[...]

    return kernel


def fc_dis_forward(params, feat):
    """feat: (B, Kf) f32, NHWC-flattened (channel-padded) conv features.
    Returns dis output of shape (B,)."""
    B, Kf = feat.shape
    Fp = params['fc0']['w'].shape[1]
    num_res = len(params['fcres'])

    tb = min(_MAX_TM, _round_up(B, 8))
    Bp = _round_up(B, tb)
    featb = jnp.pad(feat.astype(jnp.bfloat16), ((0, Bp - B), (0, 0)))

    inputs = [featb, params['fc0']['w'], params['fc0']['b'], params['fc0']['alpha']]
    in_specs = [pl.BlockSpec((tb, Kf), lambda i: (i, 0)),
                pl.BlockSpec((Kf, Fp), lambda i: (0, 0)),
                pl.BlockSpec((1, Fp), lambda i: (0, 0)),
                pl.BlockSpec((1, Fp), lambda i: (0, 0))]
    for blk in params['fcres']:
        inputs += [blk['w1'], blk['b1'], blk['alpha'], blk['w2'], blk['b2']]
        in_specs += [pl.BlockSpec((Fp, Fp), lambda i: (0, 0)),
                     pl.BlockSpec((1, Fp), lambda i: (0, 0)),
                     pl.BlockSpec((1, Fp), lambda i: (0, 0)),
                     pl.BlockSpec((Fp, Fp), lambda i: (0, 0)),
                     pl.BlockSpec((1, Fp), lambda i: (0, 0))]
    inputs += [params['dis']['w'], params['dis']['b']]
    in_specs += [pl.BlockSpec((Fp, LANE), lambda i: (0, 0)),
                 pl.BlockSpec((1, LANE), lambda i: (0, 0))]

    flops = 2 * Bp * (Kf * Fp + num_res * 2 * Fp * Fp + Fp * LANE)
    weight_bytes = sum(int(a.size) * a.dtype.itemsize for a in inputs[1:])
    bytes_accessed = weight_bytes + Bp * Kf * 2 + Bp * LANE * 4

    out = pl.pallas_call(
        _make_fc_head_kernel(num_res),
        out_shape=jax.ShapeDtypeStruct((Bp, LANE), jnp.float32),
        grid_spec=pltpu.PrefetchScalarGridSpec(
            num_scalar_prefetch=0,
            grid=(Bp // tb,),
            in_specs=in_specs,
            out_specs=pl.BlockSpec((tb, LANE), lambda i: (i, 0)),
        ),
        compiler_params=pltpu.CompilerParams(
            dimension_semantics=("parallel",),
            vmem_limit_bytes=_VMEM_LIMIT,
        ),
        cost_estimate=pl.CostEstimate(flops=flops, transcendentals=0,
                                      bytes_accessed=bytes_accessed),
    )(*inputs)
    return out[:B, 0]            # dis(...).squeeze(1); only lane 0 is real


# ----------------------- conv = im2col (wrapper, bf16) + fused matmul --------

def _im2col(x_nhwc, cin, k, stride, pad):
    x = x_nhwc[..., :cin]                               # drop padded channels
    x = jnp.pad(x, ((0, 0), (pad, pad), (pad, pad), (0, 0)))
    B, H, W, C = x.shape
    Ho = (H - k) // stride + 1
    Wo = (W - k) // stride + 1
    patches = []
    for i in range(k):
        for j in range(k):
            patches.append(x[:, i:i + stride * Ho:stride,
                              j:j + stride * Wo:stride, :])
    cols = jnp.stack(patches, axis=3)                   # (B, Ho, Wo, k*k, C)
    return cols.reshape(B * Ho * Wo, k * k * C).astype(jnp.bfloat16), (B, Ho, Wo)


def conv_layer(x_nhwc, layer, *, residual=None, res_scale=1.0):
    cols, (B, Ho, Wo) = _im2col(x_nhwc, layer['cin'], layer['k'],
                                layer['stride'], layer['pad'])
    res2d = None
    if residual is not None:
        res2d = residual.reshape(B * Ho * Wo, residual.shape[-1])
    y = fused_matmul(cols, layer['w'], layer['b'],
                     alpha=layer.get('alpha'), residual=res2d,
                     res_scale=res_scale)
    return y.reshape(B, Ho, Wo, y.shape[-1])            # channels 128-padded


# ----------------------- parameter construction ------------------------------

def get_paddings(size, num_levels):
    paddings = []
    for _ in range(num_levels - 1):
        if size % 4 == 2:
            paddings.append(1)
            size = size // 2 + 1
        else:
            paddings.append(0)
            size //= 2
    if num_levels > 0:
        paddings.append(0)
        size //= 2
    return size, paddings


def _init_conv_mat(key, out_ch, in_ch, k):
    # Mapping from a PyTorch OIHW weight: wmat[(i*k + j)*in_ch + c, o] = W[o, c, i, j]
    kw_, kb_ = jax.random.split(key)
    fan_in = in_ch * k * k
    w_oihw = jax.random.normal(kw_, (out_ch, in_ch, k, k),
                               jnp.float32) / math.sqrt(fan_in)
    wmat = jnp.transpose(w_oihw, (2, 3, 1, 0)).reshape(k * k * in_ch, out_ch)
    b = 0.01 * jax.random.normal(kb_, (out_ch,), jnp.float32)
    return wmat, b


def _init_resblock(key, in_ch, out_ch, stride, padding, res_scale):
    k1, k2, k3 = jax.random.split(key, 3)
    if stride == 2:
        k_main, p_main = 4, 1 + padding
    else:
        k_main, p_main = 3, 1
    w1, b1 = _init_conv_mat(k1, out_ch, in_ch, k_main)
    w2, b2 = _init_conv_mat(k2, out_ch, out_ch, 3)
    blk = {'res_scale': float(res_scale),
           'conv1': {'w': w1, 'b': b1,
                     'alpha': jnp.full((out_ch,), 0.25, jnp.float32),
                     'k': k_main, 'stride': stride, 'pad': p_main, 'cin': in_ch},
           'conv2': {'w': w2, 'b': b2, 'k': 3, 'stride': 1, 'pad': 1,
                     'cin': out_ch},
           'sc': None}
    if stride != 1 or in_ch != out_ch:
        ks = 4 if stride == 2 else 1
        ps = (1 + padding) if stride == 2 else 0
        ws, bs = _init_conv_mat(k3, out_ch, in_ch, ks)
        blk['sc'] = {'w': ws, 'b': bs, 'k': ks, 'stride': stride, 'pad': ps,
                     'cin': in_ch}
    return blk


def _build_fc0(key, top_channels, top_size, c_pad, fc_features, f_pad):
    kw_, kb_ = jax.random.split(key)
    in_f = top_channels * top_size * top_size
    # Weight in the PyTorch NCHW-flat row order (what WNLinear would see), then a
    # ONE-TIME row permutation + channel-pad so the kernel consumes the NHWC
    # (lane-padded) flatten directly -> no runtime transpose before fc0.
    w_nchw = jax.random.normal(kw_, (in_f, fc_features),
                               jnp.float32) / math.sqrt(in_f)
    b = 0.01 * jax.random.normal(kb_, (fc_features,), jnp.float32)
    w = w_nchw.reshape(top_channels, top_size, top_size, fc_features)
    w = jnp.transpose(w, (1, 2, 0, 3))                      # (S, S, C, F)
    w = jnp.pad(w, ((0, 0), (0, 0), (0, c_pad - top_channels), (0, 0)))
    w = w.reshape(top_size * top_size * c_pad, fc_features)
    w = jnp.pad(w, ((0, 0), (0, f_pad - fc_features))).astype(jnp.bfloat16)
    bpad = jnp.pad(b, (0, f_pad - fc_features)).reshape(1, f_pad)
    alpha = jnp.pad(jnp.full((fc_features,), 0.25, jnp.float32),
                    (0, f_pad - fc_features)).reshape(1, f_pad)
    return {'w': w, 'b': bpad, 'alpha': alpha}


def _init_fc_block(key, f, f_pad):
    k1, k2 = jax.random.split(key)

    def lin(k):
        kw_, kb_ = jax.random.split(k)
        w = jax.random.normal(kw_, (f, f), jnp.float32) / math.sqrt(f)
        b = 0.01 * jax.random.normal(kb_, (f,), jnp.float32)
        wp = jnp.pad(w, ((0, f_pad - f), (0, f_pad - f))).astype(jnp.bfloat16)
        bp = jnp.pad(b, (0, f_pad - f)).reshape(1, f_pad)
        return wp, bp

    w1, b1 = lin(k1)
    w2, b2 = lin(k2)
    alpha = jnp.pad(jnp.full((f,), 0.25, jnp.float32),
                    (0, f_pad - f)).reshape(1, f_pad)
    return {'w1': w1, 'b1': b1, 'alpha': alpha, 'w2': w2, 'b2': b2}


def _init_dis(key, f, f_pad):
    kw_, kb_ = jax.random.split(key)
    w = jax.random.normal(kw_, (f, 1), jnp.float32) / math.sqrt(f)
    b = 0.01 * jax.random.normal(kb_, (1,), jnp.float32)
    wp = jnp.pad(w, ((0, f_pad - f), (0, LANE - 1))).astype(jnp.bfloat16)
    bp = jnp.pad(b, (0, LANE - 1)).reshape(1, LANE)
    return {'w': wp, 'b': bp}


def init_discriminator(key, in_size, in_channels, conv_channels, conv_layers,
                       fc_features, fc_layers):
    num_levels = len(conv_channels)
    top_size, paddings = get_paddings(in_size, num_levels)
    top_channels = conv_channels[-1] if num_levels > 0 else in_channels
    c_pad_top = _round_up(top_channels, LANE)
    f_pad = _round_up(fc_features, LANE)
    keys = iter(jax.random.split(key, 256))

    params = {}
    c0 = conv_channels[0]
    w, b = _init_conv_mat(next(keys), c0, in_channels, 6)
    params['stem'] = {'w': w, 'b': b,
                      'alpha': jnp.full((c0,), 0.25, jnp.float32),
                      'k': 6, 'stride': 2, 'pad': 2 + paddings[0],
                      'cin': in_channels}

    blocks = []
    prev = c0
    for i in range(num_levels):
        if i > 0:
            blocks.append(_init_resblock(next(keys), prev, conv_channels[i],
                                         2, paddings[i], 1.0 / (i + 1)))
            prev = conv_channels[i]
        for _ in range(1, conv_layers[i]):
            blocks.append(_init_resblock(next(keys), prev, prev, 1, 0, 1.0))
    params['blocks'] = blocks

    params['fc0'] = _build_fc0(next(keys), top_channels, top_size, c_pad_top,
                               fc_features, f_pad)
    params['fcres'] = [_init_fc_block(next(keys), fc_features, f_pad)
                       for _ in range(fc_layers)]
    params['dis'] = _init_dis(next(keys), fc_features, f_pad)
    return params


# ----------------------- forward pass ----------------------------------------

def conv_features(params, x_nchw):
    x = jnp.transpose(x_nchw, (0, 2, 3, 1)).astype(jnp.float32)  # NCHW -> NHWC once
    x = conv_layer(x, params['stem'])                            # conv + PReLU fused
    for blk in params['blocks']:
        if blk['sc'] is not None:
            sc = conv_layer(x, blk['sc'])
        else:
            sc = x
        h = conv_layer(x, blk['conv1'])                          # conv + PReLU fused
        x = conv_layer(h, blk['conv2'], residual=sc,             # conv + residual fused
                       res_scale=blk['res_scale'])
    B = x.shape[0]
    # Plain NHWC flatten; fc0 weight rows were permuted/zero-padded at init so
    # this matches PyTorch's `conv(input).reshape(B, -1)` (NCHW) semantics.
    return x.reshape(B, -1)


def discriminator_forward(params, x, paired=None, random_offset=False,
                          reflect=False):
    # TODO(synk): random_offset (host-side Python `random` per-sample crops) is
    # non-deterministic data prep, not kernel work - not implemented.
    if paired is None:
        return fc_dis_forward(params, conv_features(params, x))
    c = conv_features(params, x)
    cp = conv_features(params, paired)
    if reflect:
        return (fc_dis_forward(params, c),
                fc_dis_forward(params, cp),
                fc_dis_forward(params, 2.0 * c - cp))
    return (fc_dis_forward(params, c), fc_dis_forward(params, cp), None)


# ----------------------- demo -------------------------------------------------

if __name__ == "__main__":
    key = jax.random.PRNGKey(0)
    kp, kx = jax.random.split(key)

    in_size, in_channels = 16, 4
    conv_channels, conv_layers = (8, 16), (1, 2)
    fc_features, fc_layers = 32, 1

    params = init_discriminator(kp, in_size, in_channels, conv_channels,
                                conv_layers, fc_features, fc_layers)
    x = jax.random.normal(kx, (2, in_channels, in_size, in_size), jnp.float32)

    fwd = jax.jit(lambda inp: discriminator_forward(params, inp))
    out = fwd(x)                                   # shape (2,)
    jax.block_until_ready(out)
    assert out.shape == (2,) and out.dtype == jnp.float32
    print("KERNEL_OK")
</pallas_src>

<mosaic_0001>
module attributes {stable_mosaic.version = 11 : i64} {
  func.func @kernel(%arg0: i32, %arg1: i32, %arg2: i32, %arg3: memref<128x256xbf16, #tpu.memory_space<vmem>>, %arg4: memref<256x128xbf16, #tpu.memory_space<vmem>>, %arg5: memref<1x128xf32, #tpu.memory_space<vmem>>, %arg6: memref<1x128xf32, #tpu.memory_space<vmem>>, %arg7: memref<128x128xf32, #tpu.memory_space<vmem>>, %arg8: memref<128x128xf32, #tpu.memory_space<vmem>>) attributes {dimension_semantics = [#tpu.dimension_semantics<parallel>, #tpu.dimension_semantics<parallel>, #tpu.dimension_semantics<arbitrary>], iteration_bounds = array<i64: 1, 1, 1>, scalar_prefetch = 0 : i64, scratch_operands = 1 : i64, tpu.core_type = #tpu.core_type<tc>, window_params = [{transform_indices = @transform_0, window_bounds = array<i64: 128, 256>}, {transform_indices = @transform_1, window_bounds = array<i64: 256, 128>}, {transform_indices = @transform_2, window_bounds = array<i64: 1, 128>}, {transform_indices = @transform_3, window_bounds = array<i64: 1, 128>}, {transform_indices = @transform_4, window_bounds = array<i64: 128, 128>}]} {
    %c0_i32 = arith.constant 0 : i32
    %0 = arith.cmpi eq, %arg2, %c0_i32 : i32
    %1 = arith.extui %0 : i1 to i32
    %c0_i32_0 = arith.constant 0 : i32
    %2 = arith.cmpi ne, %1, %c0_i32_0 : i32
    scf.if %2 {
      %cst_10 = arith.constant 0.000000e+00 : f32
      %12 = vector.broadcast %cst_10 : f32 to vector<128x128xf32>
      %c0_11 = arith.constant 0 : index
      %c0_12 = arith.constant 0 : index
      %13 = vector.load %arg8[%c0_11, %c0_12] : memref<128x128xf32, #tpu.memory_space<vmem>>, vector<128x128xf32>
      tpu.vector_store %arg8[%c0_11, %c0_12], %12 {strides = array<i32>} : memref<128x128xf32, #tpu.memory_space<vmem>>, vector<128x128xf32>,
    } else {
    }
    %c0 = arith.constant 0 : index
    %c0_1 = arith.constant 0 : index
    %3 = vector.load %arg8[%c0, %c0_1] : memref<128x128xf32, #tpu.memory_space<vmem>>, vector<128x128xf32>
    %c0_2 = arith.constant 0 : index
    %c0_3 = arith.constant 0 : index
    %4 = vector.load %arg3[%c0_2, %c0_3] : memref<128x256xbf16, #tpu.memory_space<vmem>>, vector<128x256xbf16>
    %c0_4 = arith.constant 0 : index
    %c0_5 = arith.constant 0 : index
    %5 = vector.load %arg4[%c0_4, %c0_5] : memref<256x128xbf16, #tpu.memory_space<vmem>>, vector<256x128xbf16>
    %cst = arith.constant dense<0.000000e+00> : vector<128x128xf32>
    %6 = tpu.matmul %4, %5, %cst {dimension_numbers = #tpu.dot_dimension_numbers<[1], [0], [0], [1], [0, 0, 1, 1], [], []>} : vector<128x256xbf16>, vector<256x128xbf16>, vector<128x128xf32> -> vector<128x128xf32>
    %7 = arith.addf %3, %6 : vector<128x128xf32>
    %c0_6 = arith.constant 0 : index
    %c0_7 = arith.constant 0 : index
    %8 = vector.load %arg8[%c0_6, %c0_7] : memref<128x128xf32, #tpu.memory_space<vmem>>, vector<128x128xf32>
    tpu.vector_store %arg8[%c0_6, %c0_7], %7 {strides = array<i32>} : memref<128x128xf32, #tpu.memory_space<vmem>>, vector<128x128xf32>,
    %c0_i32_8 = arith.constant 0 : i32
    %9 = arith.cmpi eq, %arg2, %c0_i32_8 : i32
    %10 = arith.extui %9 : i1 to i32
    %c0_i32_9 = arith.constant 0 : i32
    %11 = arith.cmpi ne, %10, %c0_i32_9 : i32
    scf.if %11 {
      %c0_10 = arith.constant 0 : index
      %c0_11 = arith.constant 0 : index
      %12 = vector.load %arg8[%c0_10, %c0_11] : memref<128x128xf32, #tpu.memory_space<vmem>>, vector<128x128xf32>
      %c0_12 = arith.constant 0 : index
      %c0_13 = arith.constant 0 : index
      %13 = vector.load %arg5[%c0_12, %c0_13] : memref<1x128xf32, #tpu.memory_space<vmem>>, vector<1x128xf32>
      %14 = vector.broadcast %13 : vector<1x128xf32> to vector<128x128xf32>
      %15 = arith.addf %12, %14 : vector<128x128xf32>
      %cst_14 = arith.constant 0.000000e+00 : f32
      %16 = vector.broadcast %cst_14 : f32 to vector<128x128xf32>
      %17 = arith.cmpf oge, %15, %16 : vector<128x128xf32>
      %c0_15 = arith.constant 0 : index
      %c0_16 = arith.constant 0 : index
      %18 = vector.load %arg6[%c0_15, %c0_16] : memref<1x128xf32, #tpu.memory_space<vmem>>, vector<1x128xf32>
      %19 = vector.broadcast %18 : vector<1x128xf32> to vector<128x128xf32>
      %20 = arith.mulf %15, %19 : vector<128x128xf32>
      %21 = arith.select %17, %15, %20 : vector<128x128xi1>, vector<128x128xf32>
      %c0_17 = arith.constant 0 : index
      %c0_18 = arith.constant 0 : index
      %22 = vector.load %arg7[%c0_17, %c0_18] : memref<128x128xf32, #tpu.memory_space<vmem>>, vector<128x128xf32>
      tpu.vector_store %arg7[%c0_17, %c0_18], %21 {strides = array<i32>} : memref<128x128xf32, #tpu.memory_space<vmem>>, vector<128x128xf32>,
    } else {
    }
    return
  }
  func.func @transform_0(%arg0: i32, %arg1: i32, %arg2: i32) -> (i32, i32) {
    %c0_i32 = arith.constant 0 : i32
    return %arg0, %arg2 : i32, i32
  }
  func.func @transform_1(%arg0: i32, %arg1: i32, %arg2: i32) -> (i32, i32) {
    %c0_i32 = arith.constant 0 : i32
    return %arg2, %arg1 : i32, i32
  }
  func.func @transform_2(%arg0: i32, %arg1: i32, %arg2: i32) -> (i32, i32) {
    %c0_i32 = arith.constant 0 : i32
    %c0_i32_0 = arith.constant 0 : i32
    return %c0_i32, %arg1 : i32, i32
  }
  func.func @transform_3(%arg0: i32, %arg1: i32, %arg2: i32) -> (i32, i32) {
    %c0_i32 = arith.constant 0 : i32
    %c0_i32_0 = arith.constant 0 : i32
    return %c0_i32, %arg1 : i32, i32
  }
  func.func @transform_4(%arg0: i32, %arg1: i32, %arg2: i32) -> (i32, i32) {
    %c0_i32 = arith.constant 0 : i32
    return %arg0, %arg1 : i32, i32
  }
}

module attributes {stable_mosaic.version = 11 : i64} {
  func.func @kernel(%arg0: i32, %arg1: i32, %arg2: i32, %arg3: memref<32x128xbf16, #tpu.memory_space<vmem>>, %arg4: memref<128x128xbf16, #tpu.memory_space<vmem>>, %arg5: memref<1x128xf32, #tpu.memory_space<vmem>>, %arg6: memref<1x128xf32, #tpu.memory_space<vmem>>, %arg7: memref<32x128xf32, #tpu.memory_space<vmem>>, %arg8: memref<32x128xf32, #tpu.memory_space<vmem>>) attributes {dimension_semantics = [#tpu.dimension_semantics<parallel>, #tpu.dimension_semantics<parallel>, #tpu.dimension_semantics<arbitrary>], iteration_bounds = array<i64: 1, 1, 1>, scalar_prefetch = 0 : i64, scratch_operands = 1 : i64, tpu.core_type = #tpu.core_type<tc>, window_params = [{transform_indices = @transform_0, window_bounds = array<i64: 32, 128>}, {transform_indices = @transform_1, window_bounds = array<i64: 128, 128>}, {transform_indices = @transform_2, window_bounds = array<i64: 1, 128>}, {transform_indices = @transform_3, window_bounds = array<i64: 1, 128>}, {transform_indices = @transform_4, window_bounds = array<i64: 32, 128>}]} {
    %c0_i32 = arith.constant 0 : i32
    %0 = arith.cmpi eq, %arg2, %c0_i32 : i32
    %1 = arith.extui %0 : i1 to i32
    %c0_i32_0 = arith.constant 0 : i32
    %2 = arith.cmpi ne, %1, %c0_i32_0 : i32
    scf.if %2 {
      %cst_10 = arith.constant 0.000000e+00 : f32
      %12 = vector.broadcast %cst_10 : f32 to vector<32x128xf32>
      %c0_11 = arith.constant 0 : index
      %c0_12 = arith.constant 0 : index
      %13 = vector.load %arg8[%c0_11, %c0_12] : memref<32x128xf32, #tpu.memory_space<vmem>>, vector<32x128xf32>
      tpu.vector_store %arg8[%c0_11, %c0_12], %12 {strides = array<i32>} : memref<32x128xf32, #tpu.memory_space<vmem>>, vector<32x128xf32>,
    } else {
    }
    %c0 = arith.constant 0 : index
    %c0_1 = arith.constant 0 : index
    %3 = vector.load %arg8[%c0, %c0_1] : memref<32x128xf32, #tpu.memory_space<vmem>>, vector<32x128xf32>
    %c0_2 = arith.constant 0 : index
    %c0_3 = arith.constant 0 : index
    %4 = vector.load %arg3[%c0_2, %c0_3] : memref<32x128xbf16, #tpu.memory_space<vmem>>, vector<32x128xbf16>
    %c0_4 = arith.constant 0 : index
    %c0_5 = arith.constant 0 : index
    %5 = vector.load %arg4[%c0_4, %c0_5] : memref<128x128xbf16, #tpu.memory_space<vmem>>, vector<128x128xbf16>
    %cst = arith.constant dense<0.000000e+00> : vector<32x128xf32>
    %6 = tpu.matmul %4, %5, %cst {dimension_numbers = #tpu.dot_dimension_numbers<[1], [0], [0], [1], [0, 0, 1, 1], [], []>} : vector<32x128xbf16>, vector<128x128xbf16>, vector<32x128xf32> -> vector<32x128xf32>
    %7 = arith.addf %3, %6 : vector<32x128xf32>
    %c0_6 = arith.constant 0 : index
    %c0_7 = arith.constant 0 : index
    %8 = vector.load %arg8[%c0_6, %c0_7] : memref<32x128xf32, #tpu.memory_space<vmem>>, vector<32x128xf32>
    tpu.vector_store %arg8[%c0_6, %c0_7], %7 {strides = array<i32>} : memref<32x128xf32, #tpu.memory_space<vmem>>, vector<32x128xf32>,
    %c0_i32_8 = arith.constant 0 : i32
    %9 = arith.cmpi eq, %arg2, %c0_i32_8 : i32
    %10 = arith.extui %9 : i1 to i32
    %c0_i32_9 = arith.constant 0 : i32
    %11 = arith.cmpi ne, %10, %c0_i32_9 : i32
    scf.if %11 {
      %c0_10 = arith.constant 0 : index
      %c0_11 = arith.constant 0 : index
      %12 = vector.load %arg8[%c0_10, %c0_11] : memref<32x128xf32, #tpu.memory_space<vmem>>, vector<32x128xf32>
      %c0_12 = arith.constant 0 : index
      %c0_13 = arith.constant 0 : index
      %13 = vector.load %arg5[%c0_12, %c0_13] : memref<1x128xf32, #tpu.memory_space<vmem>>, vector<1x128xf32>
      %14 = vector.broadcast %13 : vector<1x128xf32> to vector<32x128xf32>
      %15 = arith.addf %12, %14 : vector<32x128xf32>
      %cst_14 = arith.constant 0.000000e+00 : f32
      %16 = vector.broadcast %cst_14 : f32 to vector<32x128xf32>
      %17 = arith.cmpf oge, %15, %16 : vector<32x128xf32>
      %c0_15 = arith.constant 0 : index
      %c0_16 = arith.constant 0 : index
      %18 = vector.load %arg6[%c0_15, %c0_16] : memref<1x128xf32, #tpu.memory_space<vmem>>, vector<1x128xf32>
      %19 = vector.broadcast %18 : vector<1x128xf32> to vector<32x128xf32>
      %20 = arith.mulf %15, %19 : vector<32x128xf32>
      %21 = arith.select %17, %15, %20 : vector<32x128xi1>, vector<32x128xf32>
      %c0_17 = arith.constant 0 : index
      %c0_18 = arith.constant 0 : index
      %22 = vector.load %arg7[%c0_17, %c0_18] : memref<32x128xf32, #tpu.memory_space<vmem>>, vector<32x128xf32>
      tpu.vector_store %arg7[%c0_17, %c0_18], %21 {strides = array<i32>} : memref<32x128xf32, #tpu.memory_space<vmem>>, vector<32x128xf32>,
    } else {
    }
    return
  }
  func.func @transform_0(%arg0: i32, %arg1: i32, %arg2: i32) -> (i32, i32) {
    %c0_i32 = arith.constant 0 : i32
    return %arg0, %arg2 : i32, i32
  }
  func.func @transform_1(%arg0: i32, %arg1: i32, %arg2: i32) -> (i32, i32) {
    %c0_i32 = arith.constant 0 : i32
    return %arg2, %arg1 : i32, i32
  }
  func.func @transform_2(%arg0: i32, %arg1: i32, %arg2: i32) -> (i32, i32) {
    %c0_i32 = arith.constant 0 : i32
    %c0_i32_0 = arith.constant 0 : i32
    return %c0_i32, %arg1 : i32, i32
  }
  func.func @transform_3(%arg0: i32, %arg1: i32, %arg2: i32) -> (i32, i32) {
    %c0_i32 = arith.constant 0 : i32
    %c0_i32_0 = arith.constant 0 : i32
    return %c0_i32, %arg1 : i32, i32
  }
  func.func @transform_4(%arg0: i32, %arg1: i32, %arg2: i32) -> (i32, i32) {
    %c0_i32 = arith.constant 0 : i32
    return %arg0, %arg1 : i32, i32
  }
}

module attributes {stable_mosaic.version = 11 : i64} {
  func.func @kernel(%arg0: i32, %arg1: i32, %arg2: i32, %arg3: memref<32x128xbf16, #tpu.memory_space<vmem>>, %arg4: memref<128x128xbf16, #tpu.memory_space<vmem>>, %arg5: memref<1x128xf32, #tpu.memory_space<vmem>>, %arg6: memref<32x128xf32, #tpu.memory_space<vmem>>, %arg7: memref<32x128xf32, #tpu.memory_space<vmem>>) attributes {dimension_semantics = [#tpu.dimension_semantics<parallel>, #tpu.dimension_semantics<parallel>, #tpu.dimension_semantics<arbitrary>], iteration_bounds = array<i64: 1, 1, 1>, scalar_prefetch = 0 : i64, scratch_operands = 1 : i64, tpu.core_type = #tpu.core_type<tc>, window_params = [{transform_indices = @transform_0, window_bounds = array<i64: 32, 128>}, {transform_indices = @transform_1, window_bounds = array<i64: 128, 128>}, {transform_indices = @transform_2, window_bounds = array<i64: 1, 128>}, {transform_indices = @transform_3, window_bounds = array<i64: 32, 128>}]} {
    %c0_i32 = arith.constant 0 : i32
    %0 = arith.cmpi eq, %arg2, %c0_i32 : i32
    %1 = arith.extui %0 : i1 to i32
    %c0_i32_0 = arith.constant 0 : i32
    %2 = arith.cmpi ne, %1, %c0_i32_0 : i32
    scf.if %2 {
      %cst_10 = arith.constant 0.000000e+00 : f32
      %12 = vector.broadcast %cst_10 : f32 to vector<32x128xf32>
      %c0_11 = arith.constant 0 : index
      %c0_12 = arith.constant 0 : index
      %13 = vector.load %arg7[%c0_11, %c0_12] : memref<32x128xf32, #tpu.memory_space<vmem>>, vector<32x128xf32>
      tpu.vector_store %arg7[%c0_11, %c0_12], %12 {strides = array<i32>} : memref<32x128xf32, #tpu.memory_space<vmem>>, vector<32x128xf32>,
    } else {
    }
    %c0 = arith.constant 0 : index
    %c0_1 = arith.constant 0 : index
    %3 = vector.load %arg7[%c0, %c0_1] : memref<32x128xf32, #tpu.memory_space<vmem>>, vector<32x128xf32>
    %c0_2 = arith.constant 0 : index
    %c0_3 = arith.constant 0 : index
    %4 = vector.load %arg3[%c0_2, %c0_3] : memref<32x128xbf16, #tpu.memory_space<vmem>>, vector<32x128xbf16>
    %c0_4 = arith.constant 0 : index
    %c0_5 = arith.constant 0 : index
    %5 = vector.load %arg4[%c0_4, %c0_5] : memref<128x128xbf16, #tpu.memory_space<vmem>>, vector<128x128xbf16>
    %cst = arith.constant dense<0.000000e+00> : vector<32x128xf32>
    %6 = tpu.matmul %4, %5, %cst {dimension_numbers = #tpu.dot_dimension_numbers<[1], [0], [0], [1], [0, 0, 1, 1], [], []>} : vector<32x128xbf16>, vector<128x128xbf16>, vector<32x128xf32> -> vector<32x128xf32>
    %7 = arith.addf %3, %6 : vector<32x128xf32>
    %c0_6 = arith.constant 0 : index
    %c0_7 = arith.constant 0 : index
    %8 = vector.load %arg7[%c0_6, %c0_7] : memref<32x128xf32, #tpu.memory_space<vmem>>, vector<32x128xf32>
    tpu.vector_store %arg7[%c0_6, %c0_7], %7 {strides = array<i32>} : memref<32x128xf32, #tpu.memory_space<vmem>>, vector<32x128xf32>,
    %c0_i32_8 = arith.constant 0 : i32
    %9 = arith.cmpi eq, %arg2, %c0_i32_8 : i32
    %10 = arith.extui %9 : i1 to i32
    %c0_i32_9 = arith.constant 0 : i32
    %11 = arith.cmpi ne, %10, %c0_i32_9 : i32
    scf.if %11 {
      %c0_10 = arith.constant 0 : index
      %c0_11 = arith.constant 0 : index
      %12 = vector.load %arg7[%c0_10, %c0_11] : memref<32x128xf32, #tpu.memory_space<vmem>>, vector<32x128xf32>
      %c0_12 = arith.constant 0 : index
      %c0_13 = arith.constant 0 : index
      %13 = vector.load %arg5[%c0_12, %c0_13] : memref<1x128xf32, #tpu.memory_space<vmem>>, vector<1x128xf32>
      %14 = vector.broadcast %13 : vector<1x128xf32> to vector<32x128xf32>
      %15 = arith.addf %12, %14 : vector<32x128xf32>
      %c0_14 = arith.constant 0 : index
      %c0_15 = arith.constant 0 : index
      %16 = vector.load %arg6[%c0_14, %c0_15] : memref<32x128xf32, #tpu.memory_space<vmem>>, vector<32x128xf32>
      tpu.vector_store %arg6[%c0_14, %c0_15], %15 {strides = array<i32>} : memref<32x128xf32, #tpu.memory_space<vmem>>, vector<32x128xf32>,
    } else {
    }
    return
  }
  func.func @transform_0(%arg0: i32, %arg1: i32, %arg2: i32) -> (i32, i32) {
    %c0_i32 = arith.constant 0 : i32
    return %arg0, %arg2 : i32, i32
  }
  func.func @transform_1(%arg0: i32, %arg1: i32, %arg2: i32) -> (i32, i32) {
    %c0_i32 = arith.constant 0 : i32
    return %arg2, %arg1 : i32, i32
  }
  func.func @transform_2(%arg0: i32, %arg1: i32, %arg2: i32) -> (i32, i32) {
    %c0_i32 = arith.constant 0 : i32
    %c0_i32_0 = arith.constant 0 : i32
    return %c0_i32, %arg1 : i32, i32
  }
  func.func @transform_3(%arg0: i32, %arg1: i32, %arg2: i32) -> (i32, i32) {
    %c0_i32 = arith.constant 0 : i32
    return %arg0, %arg1 : i32, i32
  }
}

module attributes {stable_mosaic.version = 11 : i64} {
  func.func @kernel(%arg0: i32, %arg1: i32, %arg2: i32, %arg3: memref<32x256xbf16, #tpu.memory_space<vmem>>, %arg4: memref<256x128xbf16, #tpu.memory_space<vmem>>, %arg5: memref<1x128xf32, #tpu.memory_space<vmem>>, %arg6: memref<32x128xf32, #tpu.memory_space<vmem>>, %arg7: memref<32x128xf32, #tpu.memory_space<vmem>>, %arg8: memref<32x128xf32, #tpu.memory_space<vmem>>) attributes {dimension_semantics = [#tpu.dimension_semantics<parallel>, #tpu.dimension_semantics<parallel>, #tpu.dimension_semantics<arbitrary>], iteration_bounds = array<i64: 1, 1, 1>, scalar_prefetch = 0 : i64, scratch_operands = 1 : i64, tpu.core_type = #tpu.core_type<tc>, window_params = [{transform_indices = @transform_0, window_bounds = array<i64: 32, 256>}, {transform_indices = @transform_1, window_bounds = array<i64: 256, 128>}, {transform_indices = @transform_2, window_bounds = array<i64: 1, 128>}, {transform_indices = @transform_3, window_bounds = array<i64: 32, 128>}, {transform_indices = @transform_4, window_bounds = array<i64: 32, 128>}]} {
    %c0_i32 = arith.constant 0 : i32
    %0 = arith.cmpi eq, %arg2, %c0_i32 : i32
    %1 = arith.extui %0 : i1 to i32
    %c0_i32_0 = arith.constant 0 : i32
    %2 = arith.cmpi ne, %1, %c0_i32_0 : i32
    scf.if %2 {
      %cst_10 = arith.constant 0.000000e+00 : f32
      %12 = vector.broadcast %cst_10 : f32 to vector<32x128xf32>
      %c0_11 = arith.constant 0 : index
      %c0_12 = arith.constant 0 : index
      %13 = vector.load %arg8[%c0_11, %c0_12] : memref<32x128xf32, #tpu.memory_space<vmem>>, vector<32x128xf32>
      tpu.vector_store %arg8[%c0_11, %c0_12], %12 {strides = array<i32>} : memref<32x128xf32, #tpu.memory_space<vmem>>, vector<32x128xf32>,
    } else {
    }
    %c0 = arith.constant 0 : index
    %c0_1 = arith.constant 0 : index
    %3 = vector.load %arg8[%c0, %c0_1] : memref<32x128xf32, #tpu.memory_space<vmem>>, vector<32x128xf32>
    %c0_2 = arith.constant 0 : index
    %c0_3 = arith.constant 0 : index
    %4 = vector.load %arg3[%c0_2, %c0_3] : memref<32x256xbf16, #tpu.memory_space<vmem>>, vector<32x256xbf16>
    %c0_4 = arith.constant 0 : index
    %c0_5 = arith.constant 0 : index
    %5 = vector.load %arg4[%c0_4, %c0_5] : memref<256x128xbf16, #tpu.memory_space<vmem>>, vector<256x128xbf16>
    %cst = arith.constant dense<0.000000e+00> : vector<32x128xf32>
    %6 = tpu.matmul %4, %5, %cst {dimension_numbers = #tpu.dot_dimension_numbers<[1], [0], [0], [1], [0, 0, 1, 1], [], []>} : vector<32x256xbf16>, vector<256x128xbf16>, vector<32x128xf32> -> vector<32x128xf32>
    %7 = arith.addf %3, %6 : vector<32x128xf32>
    %c0_6 = arith.constant 0 : index
    %c0_7 = arith.constant 0 : index
    %8 = vector.load %arg8[%c0_6, %c0_7] : memref<32x128xf32, #tpu.memory_space<vmem>>, vector<32x128xf32>
    tpu.vector_store %arg8[%c0_6, %c0_7], %7 {strides = array<i32>} : memref<32x128xf32, #tpu.memory_space<vmem>>, vector<32x128xf32>,
    %c0_i32_8 = arith.constant 0 : i32
    %9 = arith.cmpi eq, %arg2, %c0_i32_8 : i32
    %10 = arith.extui %9 : i1 to i32
    %c0_i32_9 = arith.constant 0 : i32
    %11 = arith.cmpi ne, %10, %c0_i32_9 : i32
    scf.if %11 {
      %c0_10 = arith.constant 0 : index
      %c0_11 = arith.constant 0 : index
      %12 = vector.load %arg8[%c0_10, %c0_11] : memref<32x128xf32, #tpu.memory_space<vmem>>, vector<32x128xf32>
      %c0_12 = arith.constant 0 : index
      %c0_13 = arith.constant 0 : index
      %13 = vector.load %arg5[%c0_12, %c0_13] : memref<1x128xf32, #tpu.memory_space<vmem>>, vector<1x128xf32>
      %14 = vector.broadcast %13 : vector<1x128xf32> to vector<32x128xf32>
      %15 = arith.addf %12, %14 : vector<32x128xf32>
      %c0_14 = arith.constant 0 : index
      %c0_15 = arith.constant 0 : index
      %16 = vector.load %arg6[%c0_14, %c0_15] : memref<32x128xf32, #tpu.memory_space<vmem>>, vector<32x128xf32>
      %cst_16 = arith.constant 5.000000e-01 : f32
      %17 = vector.broadcast %cst_16 : f32 to vector<32x128xf32>
      %18 = arith.mulf %17, %15 : vector<32x128xf32>
      %19 = arith.addf %16, %18 : vector<32x128xf32>
      %c0_17 = arith.constant 0 : index
      %c0_18 = arith.constant 0 : index
      %20 = vector.load %arg7[%c0_17, %c0_18] : memref<32x128xf32, #tpu.memory_space<vmem>>, vector<32x128xf32>
      tpu.vector_store %arg7[%c0_17, %c0_18], %19 {strides = array<i32>} : memref<32x128xf32, #tpu.memory_space<vmem>>, vector<32x128xf32>,
    } else {
    }
    return
  }
  func.func @transform_0(%arg0: i32, %arg1: i32, %arg2: i32) -> (i32, i32) {
    %c0_i32 = arith.constant 0 : i32
    return %arg0, %arg2 : i32, i32
  }
  func.func @transform_1(%arg0: i32, %arg1: i32, %arg2: i32) -> (i32, i32) {
    %c0_i32 = arith.constant 0 : i32
    return %arg2, %arg1 : i32, i32
  }
  func.func @transform_2(%arg0: i32, %arg1: i32, %arg2: i32) -> (i32, i32) {
    %c0_i32 = arith.constant 0 : i32
    %c0_i32_0 = arith.constant 0 : i32
    return %c0_i32, %arg1 : i32, i32
  }
  func.func @transform_3(%arg0: i32, %arg1: i32, %arg2: i32) -> (i32, i32) {
    %c0_i32 = arith.constant 0 : i32
    return %arg0, %arg1 : i32, i32
  }
  func.func @transform_4(%arg0: i32, %arg1: i32, %arg2: i32) -> (i32, i32) {
    %c0_i32 = arith.constant 0 : i32
    return %arg0, %arg1 : i32, i32
  }
}

module attributes {stable_mosaic.version = 11 : i64} {
  func.func @kernel(%arg0: i32, %arg1: i32, %arg2: i32, %arg3: memref<32x256xbf16, #tpu.memory_space<vmem>>, %arg4: memref<256x128xbf16, #tpu.memory_space<vmem>>, %arg5: memref<1x128xf32, #tpu.memory_space<vmem>>, %arg6: memref<1x128xf32, #tpu.memory_space<vmem>>, %arg7: memref<32x128xf32, #tpu.memory_space<vmem>>, %arg8: memref<32x128xf32, #tpu.memory_space<vmem>>) attributes {dimension_semantics = [#tpu.dimension_semantics<parallel>, #tpu.dimension_semantics<parallel>, #tpu.dimension_semantics<arbitrary>], iteration_bounds = array<i64: 1, 1, 1>, scalar_prefetch = 0 : i64, scratch_operands = 1 : i64, tpu.core_type = #tpu.core_type<tc>, window_params = [{transform_indices = @transform_0, window_bounds = array<i64: 32, 256>}, {transform_indices = @transform_1, window_bounds = array<i64: 256, 128>}, {transform_indices = @transform_2, window_bounds = array<i64: 1, 128>}, {transform_indices = @transform_3, window_bounds = array<i64: 1, 128>}, {transform_indices = @transform_4, window_bounds = array<i64: 32, 128>}]} {
    %c0_i32 = arith.constant 0 : i32
    %0 = arith.cmpi eq, %arg2, %c0_i32 : i32
    %1 = arith.extui %0 : i1 to i32
    %c0_i32_0 = arith.constant 0 : i32
    %2 = arith.cmpi ne, %1, %c0_i32_0 : i32
    scf.if %2 {
      %cst_10 = arith.constant 0.000000e+00 : f32
      %12 = vector.broadcast %cst_10 : f32 to vector<32x128xf32>
      %c0_11 = arith.constant 0 : index
      %c0_12 = arith.constant 0 : index
      %13 = vector.load %arg8[%c0_11, %c0_12] : memref<32x128xf32, #tpu.memory_space<vmem>>, vector<32x128xf32>
      tpu.vector_store %arg8[%c0_11, %c0_12], %12 {strides = array<i32>} : memref<32x128xf32, #tpu.memory_space<vmem>>, vector<32x128xf32>,
    } else {
    }
    %c0 = arith.constant 0 : index
    %c0_1 = arith.constant 0 : index
    %3 = vector.load %arg8[%c0, %c0_1] : memref<32x128xf32, #tpu.memory_space<vmem>>, vector<32x128xf32>
    %c0_2 = arith.constant 0 : index
    %c0_3 = arith.constant 0 : index
    %4 = vector.load %arg3[%c0_2, %c0_3] : memref<32x256xbf16, #tpu.memory_space<vmem>>, vector<32x256xbf16>
    %c0_4 = arith.constant 0 : index
    %c0_5 = arith.constant 0 : index
    %5 = vector.load %arg4[%c0_4, %c0_5] : memref<256x128xbf16, #tpu.memory_space<vmem>>, vector<256x128xbf16>
    %cst = arith.constant dense<0.000000e+00> : vector<32x128xf32>
    %6 = tpu.matmul %4, %5, %cst {dimension_numbers = #tpu.dot_dimension_numbers<[1], [0], [0], [1], [0, 0, 1, 1], [], []>} : vector<32x256xbf16>, vector<256x128xbf16>, vector<32x128xf32> -> vector<32x128xf32>
    %7 = arith.addf %3, %6 : vector<32x128xf32>
    %c0_6 = arith.constant 0 : index
    %c0_7 = arith.constant 0 : index
    %8 = vector.load %arg8[%c0_6, %c0_7] : memref<32x128xf32, #tpu.memory_space<vmem>>, vector<32x128xf32>
    tpu.vector_store %arg8[%c0_6, %c0_7], %7 {strides = array<i32>} : memref<32x128xf32, #tpu.memory_space<vmem>>, vector<32x128xf32>,
    %c0_i32_8 = arith.constant 0 : i32
    %9 = arith.cmpi eq, %arg2, %c0_i32_8 : i32
    %10 = arith.extui %9 : i1 to i32
    %c0_i32_9 = arith.constant 0 : i32
    %11 = arith.cmpi ne, %10, %c0_i32_9 : i32
    scf.if %11 {
      %c0_10 = arith.constant 0 : index
      %c0_11 = arith.constant 0 : index
      %12 = vector.load %arg8[%c0_10, %c0_11] : memref<32x128xf32, #tpu.memory_space<vmem>>, vector<32x128xf32>
      %c0_12 = arith.constant 0 : index
      %c0_13 = arith.constant 0 : index
      %13 = vector.load %arg5[%c0_12, %c0_13] : memref<1x128xf32, #tpu.memory_space<vmem>>, vector<1x128xf32>
      %14 = vector.broadcast %13 : vector<1x128xf32> to vector<32x128xf32>
      %15 = arith.addf %12, %14 : vector<32x128xf32>
      %cst_14 = arith.constant 0.000000e+00 : f32
      %16 = vector.broadcast %cst_14 : f32 to vector<32x128xf32>
      %17 = arith.cmpf oge, %15, %16 : vector<32x128xf32>
      %c0_15 = arith.constant 0 : index
      %c0_16 = arith.constant 0 : index
      %18 = vector.load %arg6[%c0_15, %c0_16] : memref<1x128xf32, #tpu.memory_space<vmem>>, vector<1x128xf32>
      %19 = vector.broadcast %18 : vector<1x128xf32> to vector<32x128xf32>
      %20 = arith.mulf %15, %19 : vector<32x128xf32>
      %21 = arith.select %17, %15, %20 : vector<32x128xi1>, vector<32x128xf32>
      %c0_17 = arith.constant 0 : index
      %c0_18 = arith.constant 0 : index
      %22 = vector.load %arg7[%c0_17, %c0_18] : memref<32x128xf32, #tpu.memory_space<vmem>>, vector<32x128xf32>
      tpu.vector_store %arg7[%c0_17, %c0_18], %21 {strides = array<i32>} : memref<32x128xf32, #tpu.memory_space<vmem>>, vector<32x128xf32>,
    } else {
    }
    return
  }
  func.func @transform_0(%arg0: i32, %arg1: i32, %arg2: i32) -> (i32, i32) {
    %c0_i32 = arith.constant 0 : i32
    return %arg0, %arg2 : i32, i32
  }
  func.func @transform_1(%arg0: i32, %arg1: i32, %arg2: i32) -> (i32, i32) {
    %c0_i32 = arith.constant 0 : i32
    return %arg2, %arg1 : i32, i32
  }
  func.func @transform_2(%arg0: i32, %arg1: i32, %arg2: i32) -> (i32, i32) {
    %c0_i32 = arith.constant 0 : i32
    %c0_i32_0 = arith.constant 0 : i32
    return %c0_i32, %arg1 : i32, i32
  }
  func.func @transform_3(%arg0: i32, %arg1: i32, %arg2: i32) -> (i32, i32) {
    %c0_i32 = arith.constant 0 : i32
    %c0_i32_0 = arith.constant 0 : i32
    return %c0_i32, %arg1 : i32, i32
  }
  func.func @transform_4(%arg0: i32, %arg1: i32, %arg2: i32) -> (i32, i32) {
    %c0_i32 = arith.constant 0 : i32
    return %arg0, %arg1 : i32, i32
  }
}

module attributes {stable_mosaic.version = 11 : i64} {
  func.func @kernel(%arg0: i32, %arg1: i32, %arg2: i32, %arg3: memref<32x256xbf16, #tpu.memory_space<vmem>>, %arg4: memref<256x128xbf16, #tpu.memory_space<vmem>>, %arg5: memref<1x128xf32, #tpu.memory_space<vmem>>, %arg6: memref<32x128xf32, #tpu.memory_space<vmem>>, %arg7: memref<32x128xf32, #tpu.memory_space<vmem>>, %arg8: memref<32x128xf32, #tpu.memory_space<vmem>>) attributes {dimension_semantics = [#tpu.dimension_semantics<parallel>, #tpu.dimension_semantics<parallel>, #tpu.dimension_semantics<arbitrary>], iteration_bounds = array<i64: 1, 1, 1>, scalar_prefetch = 0 : i64, scratch_operands = 1 : i64, tpu.core_type = #tpu.core_type<tc>, window_params = [{transform_indices = @transform_0, window_bounds = array<i64: 32, 256>}, {transform_indices = @transform_1, window_bounds = array<i64: 256, 128>}, {transform_indices = @transform_2, window_bounds = array<i64: 1, 128>}, {transform_indices = @transform_3, window_bounds = array<i64: 32, 128>}, {transform_indices = @transform_4, window_bounds = array<i64: 32, 128>}]} {
    %c0_i32 = arith.constant 0 : i32
    %0 = arith.cmpi eq, %arg2, %c0_i32 : i32
    %1 = arith.extui %0 : i1 to i32
    %c0_i32_0 = arith.constant 0 : i32
    %2 = arith.cmpi ne, %1, %c0_i32_0 : i32
    scf.if %2 {
      %cst_10 = arith.constant 0.000000e+00 : f32
      %12 = vector.broadcast %cst_10 : f32 to vector<32x128xf32>
      %c0_11 = arith.constant 0 : index
      %c0_12 = arith.constant 0 : index
      %13 = vector.load %arg8[%c0_11, %c0_12] : memref<32x128xf32, #tpu.memory_space<vmem>>, vector<32x128xf32>
      tpu.vector_store %arg8[%c0_11, %c0_12], %12 {strides = array<i32>} : memref<32x128xf32, #tpu.memory_space<vmem>>, vector<32x128xf32>,
    } else {
    }
    %c0 = arith.constant 0 : index
    %c0_1 = arith.constant 0 : index
    %3 = vector.load %arg8[%c0, %c0_1] : memref<32x128xf32, #tpu.memory_space<vmem>>, vector<32x128xf32>
    %c0_2 = arith.constant 0 : index
    %c0_3 = arith.constant 0 : index
    %4 = vector.load %arg3[%c0_2, %c0_3] : memref<32x256xbf16, #tpu.memory_space<vmem>>, vector<32x256xbf16>
    %c0_4 = arith.constant 0 : index
    %c0_5 = arith.constant 0 : index
    %5 = vector.load %arg4[%c0_4, %c0_5] : memref<256x128xbf16, #tpu.memory_space<vmem>>, vector<256x128xbf16>
    %cst = arith.constant dense<0.000000e+00> : vector<32x128xf32>
    %6 = tpu.matmul %4, %5, %cst {dimension_numbers = #tpu.dot_dimension_numbers<[1], [0], [0], [1], [0, 0, 1, 1], [], []>} : vector<32x256xbf16>, vector<256x128xbf16>, vector<32x128xf32> -> vector<32x128xf32>
    %7 = arith.addf %3, %6 : vector<32x128xf32>
    %c0_6 = arith.constant 0 : index
    %c0_7 = arith.constant 0 : index
    %8 = vector.load %arg8[%c0_6, %c0_7] : memref<32x128xf32, #tpu.memory_space<vmem>>, vector<32x128xf32>
    tpu.vector_store %arg8[%c0_6, %c0_7], %7 {strides = array<i32>} : memref<32x128xf32, #tpu.memory_space<vmem>>, vector<32x128xf32>,
    %c0_i32_8 = arith.constant 0 : i32
    %9 = arith.cmpi eq, %arg2, %c0_i32_8 : i32
    %10 = arith.extui %9 : i1 to i32
    %c0_i32_9 = arith.constant 0 : i32
    %11 = arith.cmpi ne, %10, %c0_i32_9 : i32
    scf.if %11 {
      %c0_10 = arith.constant 0 : index
      %c0_11 = arith.constant 0 : index
      %12 = vector.load %arg8[%c0_10, %c0_11] : memref<32x128xf32, #tpu.memory_space<vmem>>, vector<32x128xf32>
      %c0_12 = arith.constant 0 : index
      %c0_13 = arith.constant 0 : index
      %13 = vector.load %arg5[%c0_12, %c0_13] : memref<1x128xf32, #tpu.memory_space<vmem>>, vector<1x128xf32>
      %14 = vector.broadcast %13 : vector<1x128xf32> to vector<32x128xf32>
      %15 = arith.addf %12, %14 : vector<32x128xf32>
      %c0_14 = arith.constant 0 : index
      %c0_15 = arith.constant 0 : index
      %16 = vector.load %arg6[%c0_14, %c0_15] : memref<32x128xf32, #tpu.memory_space<vmem>>, vector<32x128xf32>
      %cst_16 = arith.constant 1.000000e+00 : f32
      %17 = vector.broadcast %cst_16 : f32 to vector<32x128xf32>
      %18 = arith.mulf %17, %15 : vector<32x128xf32>
      %19 = arith.addf %16, %18 : vector<32x128xf32>
      %c0_17 = arith.constant 0 : index
      %c0_18 = arith.constant 0 : index
      %20 = vector.load %arg7[%c0_17, %c0_18] : memref<32x128xf32, #tpu.memory_space<vmem>>, vector<32x128xf32>
      tpu.vector_store %arg7[%c0_17, %c0_18], %19 {strides = array<i32>} : memref<32x128xf32, #tpu.memory_space<vmem>>, vector<32x128xf32>,
    } else {
    }
    return
  }
  func.func @transform_0(%arg0: i32, %arg1: i32, %arg2: i32) -> (i32, i32) {
    %c0_i32 = arith.constant 0 : i32
    return %arg0, %arg2 : i32, i32
  }
  func.func @transform_1(%arg0: i32, %arg1: i32, %arg2: i32) -> (i32, i32) {
    %c0_i32 = arith.constant 0 : i32
    return %arg2, %arg1 : i32, i32
  }
  func.func @transform_2(%arg0: i32, %arg1: i32, %arg2: i32) -> (i32, i32) {
    %c0_i32 = arith.constant 0 : i32
    %c0_i32_0 = arith.constant 0 : i32
    return %c0_i32, %arg1 : i32, i32
  }
  func.func @transform_3(%arg0: i32, %arg1: i32, %arg2: i32) -> (i32, i32) {
    %c0_i32 = arith.constant 0 : i32
    return %arg0, %arg1 : i32, i32
  }
  func.func @transform_4(%arg0: i32, %arg1: i32, %arg2: i32) -> (i32, i32) {
    %c0_i32 = arith.constant 0 : i32
    return %arg0, %arg1 : i32, i32
  }
}

module attributes {stable_mosaic.version = 11 : i64} {
  func.func @kernel(%arg0: i32, %arg1: memref<8x2048xbf16, #tpu.memory_space<vmem>>, %arg2: memref<2048x128xbf16, #tpu.memory_space<vmem>>, %arg3: memref<1x128xf32, #tpu.memory_space<vmem>>, %arg4: memref<1x128xf32, #tpu.memory_space<vmem>>, %arg5: memref<128x128xbf16, #tpu.memory_space<vmem>>, %arg6: memref<1x128xf32, #tpu.memory_space<vmem>>, %arg7: memref<1x128xf32, #tpu.memory_space<vmem>>, %arg8: memref<128x128xbf16, #tpu.memory_space<vmem>>, %arg9: memref<1x128xf32, #tpu.memory_space<vmem>>, %arg10: memref<128x128xbf16, #tpu.memory_space<vmem>>, %arg11: memref<1x128xf32, #tpu.memory_space<vmem>>, %arg12: memref<8x128xf32, #tpu.memory_space<vmem>>) attributes {dimension_semantics = [#tpu.dimension_semantics<parallel>], iteration_bounds = array<i64: 1>, scalar_prefetch = 0 : i64, scratch_operands = 0 : i64, tpu.core_type = #tpu.core_type<tc>, window_params = [{transform_indices = @transform_0, window_bounds = array<i64: 8, 2048>}, {pipeline_mode = #tpu.pipeline_mode<synchronous>, transform_indices = @transform_1, window_bounds = array<i64: 2048, 128>}, {pipeline_mode = #tpu.pipeline_mode<synchronous>, transform_indices = @transform_2, window_bounds = array<i64: 1, 128>}, {pipeline_mode = #tpu.pipeline_mode<synchronous>, transform_indices = @transform_3, window_bounds = array<i64: 1, 128>}, {pipeline_mode = #tpu.pipeline_mode<synchronous>, transform_indices = @transform_4, window_bounds = array<i64: 128, 128>}, {pipeline_mode = #tpu.pipeline_mode<synchronous>, transform_indices = @transform_5, window_bounds = array<i64: 1, 128>}, {pipeline_mode = #tpu.pipeline_mode<synchronous>, transform_indices = @transform_6, window_bounds = array<i64: 1, 128>}, {pipeline_mode = #tpu.pipeline_mode<synchronous>, transform_indices = @transform_7, window_bounds = array<i64: 128, 128>}, {pipeline_mode = #tpu.pipeline_mode<synchronous>, transform_indices = @transform_8, window_bounds = array<i64: 1, 128>}, {pipeline_mode = #tpu.pipeline_mode<synchronous>, transform_indices = @transform_9, window_bounds = array<i64: 128, 128>}, {pipeline_mode = #tpu.pipeline_mode<synchronous>, transform_indices = @transform_10, window_bounds = array<i64: 1, 128>}, {transform_indices = @transform_11, window_bounds = array<i64: 8, 128>}]} {
    %c0 = arith.constant 0 : index
    %c0_0 = arith.constant 0 : index
    %0 = vector.load %arg1[%c0, %c0_0] : memref<8x2048xbf16, #tpu.memory_space<vmem>>, vector<8x2048xbf16>
    %c0_1 = arith.constant 0 : index
    %c0_2 = arith.constant 0 : index
    %1 = vector.load %arg2[%c0_1, %c0_2] : memref<2048x128xbf16, #tpu.memory_space<vmem>>, vector<2048x128xbf16>
    %cst = arith.constant dense<0.000000e+00> : vector<8x128xf32>
    %2 = tpu.matmul %0, %1, %cst {dimension_numbers = #tpu.dot_dimension_numbers<[1], [0], [0], [1], [0, 0, 1, 1], [], []>} : vector<8x2048xbf16>, vector<2048x128xbf16>, vector<8x128xf32> -> vector<8x128xf32>
    %c0_3 = arith.constant 0 : index
    %c0_4 = arith.constant 0 : index
    %3 = vector.load %arg3[%c0_3, %c0_4] : memref<1x128xf32, #tpu.memory_space<vmem>>, vector<1x128xf32>
    %4 = vector.broadcast %3 : vector<1x128xf32> to vector<8x128xf32>
    %5 = arith.addf %2, %4 : vector<8x128xf32>
    %cst_5 = arith.constant 0.000000e+00 : f32
    %6 = vector.broadcast %cst_5 : f32 to vector<8x128xf32>
    %7 = arith.cmpf oge, %5, %6 : vector<8x128xf32>
    %c0_6 = arith.constant 0 : index
    %c0_7 = arith.constant 0 : index
    %8 = vector.load %arg4[%c0_6, %c0_7] : memref<1x128xf32, #tpu.memory_space<vmem>>, vector<1x128xf32>
    %9 = vector.broadcast %8 : vector<1x128xf32> to vector<8x128xf32>
    %10 = arith.mulf %5, %9 : vector<8x128xf32>
    %11 = arith.select %7, %5, %10 : vector<8x128xi1>, vector<8x128xf32>
    %12 = arith.truncf %11 : vector<8x128xf32> to vector<8x128xbf16>
    %c0_8 = arith.constant 0 : index
    %c0_9 = arith.constant 0 : index
    %13 = vector.load %arg5[%c0_8, %c0_9] : memref<128x128xbf16, #tpu.memory_space<vmem>>, vector<128x128xbf16>
    %cst_10 = arith.constant dense<0.000000e+00> : vector<8x128xf32>
    %14 = tpu.matmul %12, %13, %cst_10 {dimension_numbers = #tpu.dot_dimension_numbers<[1], [0], [0], [1], [0, 0, 1, 1], [], []>} : vector<8x128xbf16>, vector<128x128xbf16>, vector<8x128xf32> -> vector<8x128xf32>
    %c0_11 = arith.constant 0 : index
    %c0_12 = arith.constant 0 : index
    %15 = vector.load %arg6[%c0_11, %c0_12] : memref<1x128xf32, #tpu.memory_space<vmem>>, vector<1x128xf32>
    %16 = vector.broadcast %15 : vector<1x128xf32> to vector<8x128xf32>
    %17 = arith.addf %14, %16 : vector<8x128xf32>
    %cst_13 = arith.constant 0.000000e+00 : f32
    %18 = vector.broadcast %cst_13 : f32 to vector<8x128xf32>
    %19 = arith.cmpf oge, %17, %18 : vector<8x128xf32>
    %c0_14 = arith.constant 0 : index
    %c0_15 = arith.constant 0 : index
    %20 = vector.load %arg7[%c0_14, %c0_15] : memref<1x128xf32, #tpu.memory_space<vmem>>, vector<1x128xf32>
    %21 = vector.broadcast %20 : vector<1x128xf32> to vector<8x128xf32>
    %22 = arith.mulf %17, %21 : vector<8x128xf32>
    %23 = arith.select %19, %17, %22 : vector<8x128xi1>, vector<8x128xf32>
    %24 = arith.truncf %23 : vector<8x128xf32> to vector<8x128xbf16>
    %c0_16 = arith.constant 0 : index
    %c0_17 = arith.constant 0 : index
    %25 = vector.load %arg8[%c0_16, %c0_17] : memref<128x128xbf16, #tpu.memory_space<vmem>>, vector<128x128xbf16>
    %cst_18 = arith.constant dense<0.000000e+00> : vector<8x128xf32>
    %26 = tpu.matmul %24, %25, %cst_18 {dimension_numbers = #tpu.dot_dimension_numbers<[1], [0], [0], [1], [0, 0, 1, 1], [], []>} : vector<8x128xbf16>, vector<128x128xbf16>, vector<8x128xf32> -> vector<8x128xf32>
    %c0_19 = arith.constant 0 : index
    %c0_20 = arith.constant 0 : index
    %27 = vector.load %arg9[%c0_19, %c0_20] : memref<1x128xf32, #tpu.memory_space<vmem>>, vector<1x128xf32>
    %28 = vector.broadcast %27 : vector<1x128xf32> to vector<8x128xf32>
    %29 = arith.addf %26, %28 : vector<8x128xf32>
    %30 = arith.addf %11, %29 : vector<8x128xf32>
    %31 = arith.truncf %30 : vector<8x128xf32> to vector<8x128xbf16>
    %c0_21 = arith.constant 0 : index
    %c0_22 = arith.constant 0 : index
    %32 = vector.load %arg10[%c0_21, %c0_22] : memref<128x128xbf16, #tpu.memory_space<vmem>>, vector<128x128xbf16>
    %cst_23 = arith.constant dense<0.000000e+00> : vector<8x128xf32>
    %33 = tpu.matmul %31, %32, %cst_23 {dimension_numbers = #tpu.dot_dimension_numbers<[1], [0], [0], [1], [0, 0, 1, 1], [], []>} : vector<8x128xbf16>, vector<128x128xbf16>, vector<8x128xf32> -> vector<8x128xf32>
    %c0_24 = arith.constant 0 : index
    %c0_25 = arith.constant 0 : index
    %34 = vector.load %arg11[%c0_24, %c0_25] : memref<1x128xf32, #tpu.memory_space<vmem>>, vector<1x128xf32>
    %35 = vector.broadcast %34 : vector<1x128xf32> to vector<8x128xf32>
    %36 = arith.addf %33, %35 : vector<8x128xf32>
    %c0_26 = arith.constant 0 : index
    %c0_27 = arith.constant 0 : index
    %37 = vector.load %arg12[%c0_26, %c0_27] : memref<8x128xf32, #tpu.memory_space<vmem>>, vector<8x128xf32>
    tpu.vector_store %arg12[%c0_26, %c0_27], %36 {strides = array<i32>} : memref<8x128xf32, #tpu.memory_space<vmem>>, vector<8x128xf32>,
    return
  }
  func.func @transform_0(%arg0: i32) -> (i32, i32) {
    %c0_i32 = arith.constant 0 : i32
    %c0_i32_0 = arith.constant 0 : i32
    return %arg0, %c0_i32 : i32, i32
  }
  func.func @transform_1(%arg0: i32) -> (i32, i32) {
    %c0_i32 = arith.constant 0 : i32
    %c0_i32_0 = arith.constant 0 : i32
    %c0_i32_1 = arith.constant 0 : i32
    return %c0_i32, %c0_i32_0 : i32, i32
  }
  func.func @transform_2(%arg0: i32) -> (i32, i32) {
    %c0_i32 = arith.constant 0 : i32
    %c0_i32_0 = arith.constant 0 : i32
    %c0_i32_1 = arith.constant 0 : i32
    return %c0_i32, %c0_i32_0 : i32, i32
  }
  func.func @transform_3(%arg0: i32) -> (i32, i32) {
    %c0_i32 = arith.constant 0 : i32
    %c0_i32_0 = arith.constant 0 : i32
    %c0_i32_1 = arith.constant 0 : i32
    return %c0_i32, %c0_i32_0 : i32, i32
  }
  func.func @transform_4(%arg0: i32) -> (i32, i32) {
    %c0_i32 = arith.constant 0 : i32
    %c0_i32_0 = arith.constant 0 : i32
    %c0_i32_1 = arith.constant 0 : i32
    return %c0_i32, %c0_i32_0 : i32, i32
  }
  func.func @transform_5(%arg0: i32) -> (i32, i32) {
    %c0_i32 = arith.constant 0 : i32
    %c0_i32_0 = arith.constant 0 : i32
    %c0_i32_1 = arith.constant 0 : i32
    return %c0_i32, %c0_i32_0 : i32, i32
  }
  func.func @transform_6(%arg0: i32) -> (i32, i32) {
    %c0_i32 = arith.constant 0 : i32
    %c0_i32_0 = arith.constant 0 : i32
    %c0_i32_1 = arith.constant 0 : i32
    return %c0_i32, %c0_i32_0 : i32, i32
  }
  func.func @transform_7(%arg0: i32) -> (i32, i32) {
    %c0_i32 = arith.constant 0 : i32
    %c0_i32_0 = arith.constant 0 : i32
    %c0_i32_1 = arith.constant 0 : i32
    return %c0_i32, %c0_i32_0 : i32, i32
  }
  func.func @transform_8(%arg0: i32) -> (i32, i32) {
    %c0_i32 = arith.constant 0 : i32
    %c0_i32_0 = arith.constant 0 : i32
    %c0_i32_1 = arith.constant 0 : i32
    return %c0_i32, %c0_i32_0 : i32, i32
  }
  func.func @transform_9(%arg0: i32) -> (i32, i32) {
    %c0_i32 = arith.constant 0 : i32
    %c0_i32_0 = arith.constant 0 : i32
    %c0_i32_1 = arith.constant 0 : i32
    return %c0_i32, %c0_i32_0 : i32, i32
  }
  func.func @transform_10(%arg0: i32) -> (i32, i32) {
    %c0_i32 = arith.constant 0 : i32
    %c0_i32_0 = arith.constant 0 : i32
    %c0_i32_1 = arith.constant 0 : i32
    return %c0_i32, %c0_i32_0 : i32, i32
  }
  func.func @transform_11(%arg0: i32) -> (i32, i32) {
    %c0_i32 = arith.constant 0 : i32
    %c0_i32_0 = arith.constant 0 : i32
    return %arg0, %c0_i32 : i32, i32
  }
}

</mosaic_0001>

<bundles_post_ra>
// kernel: _lambda_.7
= control target key start
LH: loop header
LB: loop body
LE: loop exit
PB: predicated region body
PF: predicated region fallthrough
CT: control target
= control target key end

     0   :  { %s889_s1 = inlined_call_operand.vmem [shape: bf16[256,128], index: 1, kind: input, shape index: {}]   ;;  %s890_s0 = inlined_call_operand.vmem [shape: bf16[128,256], index: 0, kind: input, shape index: {}]   ;;  %s891_s2 = inlined_call_operand.vmem [shape: f32[1,128], index: 2, kind: input, shape index: {}]   ;;  %s892_s3 = inlined_call_operand.vmem [shape: f32[1,128], index: 3, kind: input, shape index: {}]   ;;  %s893_s4 = inlined_call_operand.vmem [shape: f32[128,128], index: 4, kind: output, shape index: {}]  }
   0x1   :  { %v638_v0 = vld [vmem:[%s889_s1 + $0x40] sm:$0xff]   ;;  %v640_v2 = vld [vmem:[%s889_s1 + $0x48] sm:$0xff]   ;;  %v642_v4 = vld [vmem:[%s889_s1 + $0x50] sm:$0xff]  }
   0x2   :  { %v639_v1 = vld [vmem:[%s889_s1] sm:$0xff]   ;;  %558 = vmatprep.subr.bf16.mxu0 %v638_v0  ;;  %622 = vmatprep.subr.bf16.mxu1 %v638_v0  ;;  %v641_v3 = vld [vmem:[%s889_s1 + $0x8] sm:$0xff]   ;;  %v643_v5 = vld [vmem:[%s889_s1 + $0x10] sm:$0xff]  }
   0x3   :  { %559 = vmatpush3.bf16.msra.mxu0 %v639_v1  ;;  %630 = vmatpush3.bf16.msra.mxu1 %v639_v1  ;;  %v644_v6 = vld [vmem:[%s889_s1 + $0x58] sm:$0xff]   ;;  %v646_v8 = vld [vmem:[%s889_s1 + $0x60] sm:$0xff]   ;;  %v648_v10 = vld [vmem:[%s889_s1 + $0x68] sm:$0xff]  }
   0x4   :  { %560 = vmatprep.subr.bf16.mxu0 %v640_v2  ;;  %623 = vmatprep.subr.bf16.mxu1 %v640_v2  ;;  %v645_v7 = vld [vmem:[%s889_s1 + $0x18] sm:$0xff]   ;;  %v647_v9 = vld [vmem:[%s889_s1 + $0x20] sm:$0xff]   ;;  %v649_v13 = vld [vmem:[%s889_s1 + $0x28] sm:$0xff]  }
   0x5   :  { %v656_v11 = vld [vmem:[%s890_s0 + $0x4] ss:$8 sps:$4 sm:$0xff]   ;;  %v650_v14 = vld [vmem:[%s889_s1 + $0x70] sm:$0xff]   ;;  %v652_v16 = vld [vmem:[%s889_s1 + $0x78] sm:$0xff]  }
   0x6   :  { %v659_v12 = vld [vmem:[%s890_s0 + $0x44] ss:$8 sps:$4 sm:$0xff]   ;;  %310 = vmatprep.mubr.bf16.mxu0 %v656_v11  ;;  %v651_v15 = vld [vmem:[%s889_s1 + $0x30] sm:$0xff]   ;;  %v653_v17 = vld [vmem:[%s889_s1 + $0x38] sm:$0xff]  }
   0x7   :  { %561 = vmatpush3.bf16.msra.mxu0 %v641_v3  ;;  %631 = vmatpush3.bf16.msra.mxu1 %v641_v3  ;;  %v654_v18 = vld [vmem:[%s890_s0] ss:$8 sps:$4 sm:$0xff]   ;;  %v660_v20 = vld [vmem:[%s890_s0 + $0x14] ss:$8 sps:$4 sm:$0xff]   ;;  %v664_v22 = vld [vmem:[%s890_s0 + $0x10] ss:$8 sps:$4 sm:$0xff]  }
   0x8   :  { %562 = vmatprep.subr.bf16.mxu0 %v642_v4  ;;  %624 = vmatprep.subr.bf16.mxu1 %v642_v4  ;;  %v657_v19 = vld [vmem:[%s890_s0 + $0x40] ss:$8 sps:$4 sm:$0xff]   ;;  %v662_v21 = vld [vmem:[%s890_s0 + $0x54] ss:$8 sps:$4 sm:$0xff]   ;;  %v665_v23 = vld [vmem:[%s890_s0 + $0x50] ss:$8 sps:$4 sm:$0xff]  }
   0x9   :  { %342 = vmatprep.mubr.bf16.mxu1 %v659_v12  ;;  %v666_v24 = vld [vmem:[%s890_s0 + $0x24] ss:$8 sps:$4 sm:$0xff]   ;;  %v670_v26 = vld [vmem:[%s890_s0 + $0x20] ss:$8 sps:$4 sm:$0xff]   ;;  %v672_v28 = vld [vmem:[%s890_s0 + $0x34] ss:$8 sps:$4 sm:$0xff]  }
   0xa   :  { %v668_v25 = vld [vmem:[%s890_s0 + $0x64] ss:$8 sps:$4 sm:$0xff]   ;;  %v671_v27 = vld [vmem:[%s890_s0 + $0x60] ss:$8 sps:$4 sm:$0xff]   ;;  %v674_v29 = vld [vmem:[%s890_s0 + $0x74] ss:$8 sps:$4 sm:$0xff]  }
   0xb   :  { %563 = vmatpush3.bf16.msra.mxu0 %v643_v5  ;;  %632 = vmatpush3.bf16.msra.mxu1 %v643_v5  ;;  %v676_v30 = vld [vmem:[%s890_s0 + $0x30] ss:$8 sps:$4 sm:$0xff]   ;;  %v802_v35 = vld [vmem:[%s891_s2] ss:$0 sm:$0xff] }
   0xc   :  { %564 = vmatprep.subr.bf16.mxu0 %v644_v6  ;;  %625 = vmatprep.subr.bf16.mxu1 %v644_v6  ;;  %v677_v31 = vld [vmem:[%s890_s0 + $0x70] ss:$8 sps:$4 sm:$0xff]   ;;  %v807_v41 = vld [vmem:[%s892_s3] ss:$0 sm:$0xff] }
   0xf   :  { %565 = vmatpush3.bf16.msra.mxu0 %v645_v7  ;;  %633 = vmatpush3.bf16.msra.mxu1 %v645_v7 }
  0x10   :  { %566 = vmatprep.subr.bf16.mxu0 %v646_v8  ;;  %626 = vmatprep.subr.bf16.mxu1 %v646_v8 }
  0x13   :  { %567 = vmatpush3.bf16.msra.mxu0 %v647_v9  ;;  %634 = vmatpush3.bf16.msra.mxu1 %v647_v9 }
  0x14   :  { %568 = vmatprep.subr.bf16.mxu0 %v648_v10  ;;  %627 = vmatprep.subr.bf16.mxu1 %v648_v10 }
  0x17   :  { %569 = vmatpush3.bf16.msra.mxu0 %v649_v13  ;;  %635 = vmatpush3.bf16.msra.mxu1 %v649_v13 }
  0x18   :  { %570 = vmatprep.subr.bf16.mxu0 %v650_v14  ;;  %628 = vmatprep.subr.bf16.mxu1 %v650_v14 }
  0x1b   :  { %571 = vmatpush3.bf16.msra.mxu0 %v651_v15  ;;  %636 = vmatpush3.bf16.msra.mxu1 %v651_v15 }
  0x1c   :  { %572 = vmatprep.subr.bf16.mxu0 %v652_v16  ;;  %629 = vmatprep.subr.bf16.mxu1 %v652_v16 }
  0x1f   :  { %573 = vmatpush3.bf16.msra.mxu0 %v653_v17  ;;  %637 = vmatpush3.bf16.msra.mxu1 %v653_v17 }
  0x22   :  { %311 = vmatmul.mubr.bf16.vlgmr.msra.gmra.mrb[0].mxu0 %v654_v18  ;;  %343 = vmatmul.mubr.bf16.vlgmr.msra.gmra.mrb[0].mxu1 %v657_v19 }
  0x23   :  { %318 = vmatprep.mubr.bf16.mxu0 %v660_v20  ;;  %350 = vmatprep.mubr.bf16.mxu1 %v662_v21 }
  0x2a   :  { %319 = vmatmul.mubr.bf16.gmra.mrb[4].mxu0 %v664_v22  ;;  %351 = vmatmul.mubr.bf16.gmra.mrb[4].mxu1 %v665_v23 }
  0x2b   :  { %326 = vmatprep.mubr.bf16.mxu0 %v666_v24  ;;  %358 = vmatprep.mubr.bf16.mxu1 %v668_v25 }
  0x32   :  { %327 = vmatmul.mubr.bf16.gmra.mrb[8].mxu0 %v670_v26  ;;  %359 = vmatmul.mubr.bf16.gmra.mrb[8].mxu1 %v671_v27 }
  0x33   :  { %334 = vmatprep.mubr.bf16.mxu0 %v672_v28  ;;  %366 = vmatprep.mubr.bf16.mxu1 %v674_v29 }
  0x3a   :  { %335 = vmatmul.mubr.bf16.gmra.mrb[12].mxu0 %v676_v30  ;;  %367 = vmatmul.mubr.bf16.gmra.mrb[12].mxu1 %v677_v31 }
  0xf5   :  { %v574_v32 = vpop.f32.mrb[0].mxu0  ;;  %v598_v33 = vpop.f32.mrb[0].mxu1 }
  0xf6   :  { %v575_v34 = vpop.f32.mrb[1].mxu0  ;;  %v599_v36 = vpop.f32.mrb[1].mxu1 }
  0xf7   :  { %v576_v37 = vadd.f32 %v575_v34, %v574_v32  ;;  %v600_v38 = vadd.f32 %v599_v36, %v598_v33  ;;  %v577_v39 = vpop.f32.mrb[2].mxu0  ;;  %v601_v40 = vpop.f32.mrb[2].mxu1 }
  0xf8   :  { %v578_v42 = vpop.f32.mrb[3].mxu0  ;;  %v602_v43 = vpop.f32.mrb[3].mxu1 }
  0xf9   :  { %v433_v44 = vadd.f32 %v576_v37, %v802_v35  ;;  %v441_v45 = vadd.f32 %v600_v38, %v802_v35  ;;  %v579_v46 = vadd.f32 %v578_v42, %v577_v39  ;;  %v603_v47 = vadd.f32 %v602_v43, %v601_v40 }
  0xfb   :  { %vm449_vm0 = vcmp.ge.f32.partialorder %v433_v44, 0.0  ;;  %v472_v48 = vmul.f32 %v807_v41, %v433_v44  ;;  %vm457_vm1 = vcmp.ge.f32.partialorder %v441_v45, 0.0  ;;  %v480_v49 = vmul.f32 %v807_v41, %v441_v45 }
  0xfc   :  { %v434_v50 = vadd.f32 %v579_v46, %v802_v35  ;;  %v442_v51 = vadd.f32 %v603_v47, %v802_v35 }
  0xfd   :  { %v488_v52 = vsel %vm449_vm0, %v433_v44, %v472_v48  ;;  %v496_v53 = vsel %vm457_vm1, %v441_v45, %v480_v49  ;;  %v580_v54 = vpop.f32.mrb[4].mxu0  ;;  %v604_v55 = vpop.f32.mrb[4].mxu1 }
  0xfe   :  { %504 = vst [vmem:[%s893_s4] sm:$0xff] %v488_v52  ;;  %512 = vst [vmem:[%s893_s4 + $0x40] sm:$0xff] %v496_v53  ;;  %vm450_vm2 = vcmp.ge.f32.partialorder %v434_v50, 0.0  ;;  %v473_v56 = vmul.f32 %v807_v41, %v434_v50  ;;  %vm458_vm3 = vcmp.ge.f32.partialorder %v442_v51, 0.0  ;;  %v481_v57 = vmul.f32 %v807_v41, %v442_v51  ;;  %v581_v58 = vpop.f32.mrb[5].mxu0  ;;  %v605_v59 = vpop.f32.mrb[5].mxu1 }
  0xff   :  { %v582_v60 = vadd.f32 %v581_v58, %v580_v54  ;;  %v606_v61 = vadd.f32 %v605_v59, %v604_v55  ;;  %v583_v62 = vpop.f32.mrb[6].mxu0  ;;  %v607_v63 = vpop.f32.mrb[6].mxu1 }
 0x100   :  { %v489_v0 = vsel %vm450_vm2, %v434_v50, %v473_v56  ;;  %v497_v1 = vsel %vm458_vm3, %v442_v51, %v481_v57  ;;  %v584_v2 = vpop.f32.mrb[7].mxu0  ;;  %v608_v3 = vpop.f32.mrb[7].mxu1 }
 0x101   :  { %505 = vst [vmem:[%s893_s4 + $0x8] sm:$0xff] %v489_v0  ;;  %513 = vst [vmem:[%s893_s4 + $0x48] sm:$0xff] %v497_v1  ;;  %v435_v4 = vadd.f32 %v582_v60, %v802_v35  ;;  %v443_v5 = vadd.f32 %v606_v61, %v802_v35  ;;  %v585_v6 = vadd.f32 %v584_v2, %v583_v62 }
 0x102   :  { %v609_v7 = vadd.f32 %v608_v3, %v607_v63 }
 0x103   :  { %vm451_vm4 = vcmp.ge.f32.partialorder %v435_v4, 0.0  ;;  %v474_v8 = vmul.f32 %v807_v41, %v435_v4  ;;  %vm459_vm5 = vcmp.ge.f32.partialorder %v443_v5, 0.0  ;;  %v482_v9 = vmul.f32 %v807_v41, %v443_v5 }
 0x104   :  { %v436_v10 = vadd.f32 %v585_v6, %v802_v35  ;;  %v444_v11 = vadd.f32 %v609_v7, %v802_v35 }
 0x105   :  { %v490_v12 = vsel %vm451_vm4, %v435_v4, %v474_v8  ;;  %v498_v13 = vsel %vm459_vm5, %v443_v5, %v482_v9  ;;  %v586_v14 = vpop.f32.mrb[8].mxu0  ;;  %v610_v15 = vpop.f32.mrb[8].mxu1 }
 0x106   :  { %506 = vst [vmem:[%s893_s4 + $0x10] sm:$0xff] %v490_v12  ;;  %514 = vst [vmem:[%s893_s4 + $0x50] sm:$0xff] %v498_v13  ;;  %vm452_vm6 = vcmp.ge.f32.partialorder %v436_v10, 0.0  ;;  %v475_v16 = vmul.f32 %v807_v41, %v436_v10  ;;  %vm460_vm7 = vcmp.ge.f32.partialorder %v444_v11, 0.0  ;;  %v483_v17 = vmul.f32 %v807_v41, %v444_v11  ;;  %v587_v18 = vpop.f32.mrb[9].mxu0  ;;  %v611_v19 = vpop.f32.mrb[9].mxu1 }
 0x107   :  { %v588_v20 = vadd.f32 %v587_v18, %v586_v14  ;;  %v612_v21 = vadd.f32 %v611_v19, %v610_v15  ;;  %v589_v22 = vpop.f32.mrb[10].mxu0  ;;  %v613_v23 = vpop.f32.mrb[10].mxu1 }
 0x108   :  { %v491_v24 = vsel %vm452_vm6, %v436_v10, %v475_v16  ;;  %v499_v25 = vsel %vm460_vm7, %v444_v11, %v483_v17  ;;  %v590_v26 = vpop.f32.mrb[11].mxu0  ;;  %v614_v27 = vpop.f32.mrb[11].mxu1 }
 0x109   :  { %507 = vst [vmem:[%s893_s4 + $0x18] sm:$0xff] %v491_v24  ;;  %515 = vst [vmem:[%s893_s4 + $0x58] sm:$0xff] %v499_v25  ;;  %v437_v28 = vadd.f32 %v588_v20, %v802_v35  ;;  %v445_v29 = vadd.f32 %v612_v21, %v802_v35  ;;  %v591_v30 = vadd.f32 %v590_v26, %v589_v22 }
 0x10a   :  { %v615_v31 = vadd.f32 %v614_v27, %v613_v23 }
 0x10b   :  { %vm453_vm8 = vcmp.ge.f32.partialorder %v437_v28, 0.0  ;;  %v476_v32 = vmul.f32 %v807_v41, %v437_v28  ;;  %vm461_vm9 = vcmp.ge.f32.partialorder %v445_v29, 0.0  ;;  %v484_v33 = vmul.f32 %v807_v41, %v445_v29 }
 0x10c   :  { %v438_v34 = vadd.f32 %v591_v30, %v802_v35  ;;  %v446_v36 = vadd.f32 %v615_v31, %v802_v35 }
 0x10d   :  { %v492_v37 = vsel %vm453_vm8, %v437_v28, %v476_v32  ;;  %v500_v38 = vsel %vm461_vm9, %v445_v29, %v484_v33  ;;  %v592_v39 = vpop.f32.mrb[12].mxu0  ;;  %v616_v40 = vpop.f32.mrb[12].mxu1 }
 0x10e   :  { %508 = vst [vmem:[%s893_s4 + $0x20] sm:$0xff] %v492_v37  ;;  %516 = vst [vmem:[%s893_s4 + $0x60] sm:$0xff] %v500_v38  ;;  %vm454_vm10 = vcmp.ge.f32.partialorder %v438_v34, 0.0  ;;  %v477_v42 = vmul.f32 %v807_v41, %v438_v34  ;;  %vm462_vm11 = vcmp.ge.f32.partialorder %v446_v36, 0.0  ;;  %v485_v43 = vmul.f32 %v807_v41, %v446_v36  ;;  %v593_v44 = vpop.f32.mrb[13].mxu0  ;;  %v617_v45 = vpop.f32.mrb[13].mxu1 }
 0x10f   :  { %v594_v46 = vadd.f32 %v593_v44, %v592_v39  ;;  %v618_v47 = vadd.f32 %v617_v45, %v616_v40  ;;  %v595_v48 = vpop.f32.mrb[14].mxu0  ;;  %v619_v49 = vpop.f32.mrb[14].mxu1 }
 0x110   :  { %v493_v50 = vsel %vm454_vm10, %v438_v34, %v477_v42  ;;  %v501_v51 = vsel %vm462_vm11, %v446_v36, %v485_v43  ;;  %v596_v52 = vpop.f32.mrb[15].mxu0  ;;  %v620_v53 = vpop.f32.mrb[15].mxu1 }
 0x111   :  { %509 = vst [vmem:[%s893_s4 + $0x28] sm:$0xff] %v493_v50  ;;  %517 = vst [vmem:[%s893_s4 + $0x68] sm:$0xff] %v501_v51  ;;  %v439_v54 = vadd.f32 %v594_v46, %v802_v35  ;;  %v447_v55 = vadd.f32 %v618_v47, %v802_v35  ;;  %v597_v56 = vadd.f32 %v596_v52, %v595_v48 }
 0x112   :  { %v621_v57 = vadd.f32 %v620_v53, %v619_v49 }
 0x113   :  { %vm455_vm12 = vcmp.ge.f32.partialorder %v439_v54, 0.0  ;;  %v478_v58 = vmul.f32 %v807_v41, %v439_v54  ;;  %vm463_vm13 = vcmp.ge.f32.partialorder %v447_v55, 0.0  ;;  %v486_v59 = vmul.f32 %v807_v41, %v447_v55 }
 0x114   :  { %v440_v60 = vadd.f32 %v597_v56, %v802_v35  ;;  %v448_v61 = vadd.f32 %v621_v57, %v802_v35 }
 0x115   :  { %v494_v62 = vsel %vm455_vm12, %v439_v54, %v478_v58  ;;  %v502_v63 = vsel %vm463_vm13, %v447_v55, %v486_v59 }
 0x116   :  { %510 = vst [vmem:[%s893_s4 + $0x30] sm:$0xff] %v494_v62  ;;  %518 = vst [vmem:[%s893_s4 + $0x70] sm:$0xff] %v502_v63  ;;  %vm456_vm14 = vcmp.ge.f32.partialorder %v440_v60, 0.0  ;;  %v479_v0 = vmul.f32 %v807_v41, %v440_v60  ;;  %vm464_vm15 = vcmp.ge.f32.partialorder %v448_v61, 0.0  ;;  %v487_v1 = vmul.f32 %v807_v41, %v448_v61 }
 0x118   :  { %v495_v2 = vsel %vm456_vm14, %v440_v60, %v479_v0  ;;  %v503_v3 = vsel %vm464_vm15, %v448_v61, %v487_v1 }
 0x119   :  { %511 = vst [vmem:[%s893_s4 + $0x38] sm:$0xff] %v495_v2  ;;  %519 = vst [vmem:[%s893_s4 + $0x78] sm:$0xff] %v503_v3 }

// kernel: _lambda_.9
= control target key start
LH: loop header
LB: loop body
LE: loop exit
PB: predicated region body
PF: predicated region fallthrough
CT: control target
= control target key end

     0   :  { %s337_s1 = inlined_call_operand.vmem [shape: bf16[128,128], index: 1, kind: input, shape index: {}]   ;;  %s338_s0 = inlined_call_operand.vmem [shape: bf16[32,128], index: 0, kind: input, shape index: {}]   ;;  %s339_s2 = inlined_call_operand.vmem [shape: f32[1,128], index: 2, kind: input, shape index: {}]   ;;  %s340_s3 = inlined_call_operand.vmem [shape: f32[1,128], index: 3, kind: input, shape index: {}]   ;;  %s341_s4 = inlined_call_operand.vmem [shape: f32[32,128], index: 4, kind: output, shape index: {}]  }
   0x1   :  { %v254_v0 = vld [vmem:[%s337_s1] sm:$0xff]   ;;  %v255_v1 = vld [vmem:[%s337_s1 + $0x8] sm:$0xff]   ;;  %v256_v2 = vld [vmem:[%s337_s1 + $0x10] sm:$0xff]  }
   0x2   :  { %234 = vmatprep.subr.bf16.mxu0 %v254_v0  ;;  %v257_v3 = vld [vmem:[%s337_s1 + $0x18] sm:$0xff]   ;;  %v262_v4 = vld [vmem:[%s338_s0] sm:$0xff]   ;;  %v259_v6 = vld [vmem:[%s337_s1 + $0x28] sm:$0xff]  }
   0x3   :  { %235 = vmatpush3.bf16.msra.mxu0 %v254_v0  ;;  %250 = vmatprep.mubr.bf16.mxu0 %v262_v4  ;;  %v258_v5 = vld [vmem:[%s337_s1 + $0x20] sm:$0xff]   ;;  %v260_v7 = vld [vmem:[%s337_s1 + $0x30] sm:$0xff]   ;;  %v261_v8 = vld [vmem:[%s337_s1 + $0x38] sm:$0xff]  }
   0x4   :  { %236 = vmatprep.subr.bf16.mxu0 %v255_v1  ;;  %v263_v9 = vld [vmem:[%s338_s0 + $0x8] sm:$0xff]   ;;  %v222_v10 = vld [vmem:[%s339_s2] ss:$0 sm:$0xff] }
   0x5   :  { %v223_v12 = vld [vmem:[%s340_s3] ss:$0 sm:$0xff] }
   0x7   :  { %237 = vmatpush3.bf16.msra.mxu0 %v255_v1 }
   0x8   :  { %238 = vmatprep.subr.bf16.mxu0 %v256_v2 }
   0xb   :  { %239 = vmatpush3.bf16.msra.mxu0 %v256_v2 }
   0xc   :  { %240 = vmatprep.subr.bf16.mxu0 %v257_v3 }
   0xf   :  { %241 = vmatpush3.bf16.msra.mxu0 %v257_v3 }
  0x10   :  { %242 = vmatprep.subr.bf16.mxu0 %v258_v5 }
  0x13   :  { %243 = vmatpush3.bf16.msra.mxu0 %v258_v5 }
  0x14   :  { %244 = vmatprep.subr.bf16.mxu0 %v259_v6 }
  0x17   :  { %245 = vmatpush3.bf16.msra.mxu0 %v259_v6 }
  0x18   :  { %246 = vmatprep.subr.bf16.mxu0 %v260_v7 }
  0x1b   :  { %247 = vmatpush3.bf16.msra.mxu0 %v260_v7 }
  0x1c   :  { %248 = vmatprep.subr.bf16.mxu0 %v261_v8 }
  0x1f   :  { %249 = vmatpush3.bf16.msra.mxu0 %v261_v8 }
  0x22   :  { %251 = vmatmul.mubr.bf16.vlgmr.msra.gmra.mrb[0].mxu0 %v263_v9 }
  0xf5   :  { %v252_v11 = vpop.f32.mrb[0].mxu0 }
  0xf6   :  { %v183_v13 = vadd.f32 %v252_v11, %v222_v10  ;;  %v144_v14 = vpop.f32.mrb[1].mxu0 }
  0xf7   :  { %v181_v15 = vadd.f32 %v222_v10, %v144_v14  ;;  %v253_v16 = vpop.f32.mrb[2].mxu0 }
  0xf8   :  { %vm187_vm0 = vcmp.ge.f32.partialorder %v183_v13, 0.0  ;;  %v198_v17 = vmul.f32 %v223_v12, %v183_v13  ;;  %v184_v18 = vadd.f32 %v253_v16, %v222_v10  ;;  %v147_v19 = vpop.f32.mrb[3].mxu0 }
  0xf9   :  { %vm185_vm1 = vcmp.ge.f32.partialorder %v181_v15, 0.0  ;;  %v196_v20 = vmul.f32 %v223_v12, %v181_v15  ;;  %v182_v21 = vadd.f32 %v222_v10, %v147_v19 }
  0xfa   :  { %v202_v22 = vsel %vm187_vm0, %v183_v13, %v198_v17  ;;  %vm188_vm2 = vcmp.ge.f32.partialorder %v184_v18, 0.0  ;;  %v199_v23 = vmul.f32 %v223_v12, %v184_v18 }
  0xfb   :  { %206 = vst [vmem:[%s341_s4 + $0x10] sm:$0xff] %v202_v22  ;;  %v200_v24 = vsel %vm185_vm1, %v181_v15, %v196_v20  ;;  %vm186_vm3 = vcmp.ge.f32.partialorder %v182_v21, 0.0  ;;  %v197_v25 = vmul.f32 %v223_v12, %v182_v21 }
  0xfc   :  { %204 = vst [vmem:[%s341_s4] sm:$0xff] %v200_v24  ;;  %v203_v26 = vsel %vm188_vm2, %v184_v18, %v199_v23 }
  0xfd   :  { %207 = vst [vmem:[%s341_s4 + $0x18] sm:$0xff] %v203_v26  ;;  %v201_v27 = vsel %vm186_vm3, %v182_v21, %v197_v25 }
  0xfe   :  { %205 = vst [vmem:[%s341_s4 + $0x8] sm:$0xff] %v201_v27 }

// kernel: _lambda_.8
= control target key start
LH: loop header
LB: loop body
LE: loop exit
PB: predicated region body
PF: predicated region fallthrough
CT: control target
= control target key end

     0   :  { %s306_s1 = inlined_call_operand.vmem [shape: bf16[128,128], index: 1, kind: input, shape index: {}]   ;;  %s307_s0 = inlined_call_operand.vmem [shape: bf16[32,128], index: 0, kind: input, shape index: {}]   ;;  %s308_s2 = inlined_call_operand.vmem [shape: f32[1,128], index: 2, kind: input, shape index: {}]   ;;  %s309_s3 = inlined_call_operand.vmem [shape: f32[32,128], index: 3, kind: output, shape index: {}]  }
   0x1   :  { %v231_v0 = vld [vmem:[%s306_s1] sm:$0xff]   ;;  %v232_v1 = vld [vmem:[%s306_s1 + $0x8] sm:$0xff]   ;;  %v233_v2 = vld [vmem:[%s306_s1 + $0x10] sm:$0xff]  }
   0x2   :  { %211 = vmatprep.subr.bf16.mxu0 %v231_v0  ;;  %v234_v3 = vld [vmem:[%s306_s1 + $0x18] sm:$0xff]   ;;  %v239_v4 = vld [vmem:[%s307_s0] sm:$0xff]   ;;  %v236_v6 = vld [vmem:[%s306_s1 + $0x28] sm:$0xff]  }
   0x3   :  { %212 = vmatpush3.bf16.msra.mxu0 %v231_v0  ;;  %227 = vmatprep.mubr.bf16.mxu0 %v239_v4  ;;  %v235_v5 = vld [vmem:[%s306_s1 + $0x20] sm:$0xff]   ;;  %v237_v7 = vld [vmem:[%s306_s1 + $0x30] sm:$0xff]   ;;  %v238_v8 = vld [vmem:[%s306_s1 + $0x38] sm:$0xff]  }
   0x4   :  { %213 = vmatprep.subr.bf16.mxu0 %v232_v1  ;;  %v240_v9 = vld [vmem:[%s307_s0 + $0x8] sm:$0xff]   ;;  %v200_v10 = vld [vmem:[%s308_s2] ss:$0 sm:$0xff] }
   0x7   :  { %214 = vmatpush3.bf16.msra.mxu0 %v232_v1 }
   0x8   :  { %215 = vmatprep.subr.bf16.mxu0 %v233_v2 }
   0xb   :  { %216 = vmatpush3.bf16.msra.mxu0 %v233_v2 }
   0xc   :  { %217 = vmatprep.subr.bf16.mxu0 %v234_v3 }
   0xf   :  { %218 = vmatpush3.bf16.msra.mxu0 %v234_v3 }
  0x10   :  { %219 = vmatprep.subr.bf16.mxu0 %v235_v5 }
  0x13   :  { %220 = vmatpush3.bf16.msra.mxu0 %v235_v5 }
  0x14   :  { %221 = vmatprep.subr.bf16.mxu0 %v236_v6 }
  0x17   :  { %222 = vmatpush3.bf16.msra.mxu0 %v236_v6 }
  0x18   :  { %223 = vmatprep.subr.bf16.mxu0 %v237_v7 }
  0x1b   :  { %224 = vmatpush3.bf16.msra.mxu0 %v237_v7 }
  0x1c   :  { %225 = vmatprep.subr.bf16.mxu0 %v238_v8 }
  0x1f   :  { %226 = vmatpush3.bf16.msra.mxu0 %v238_v8 }
  0x22   :  { %228 = vmatmul.mubr.bf16.vlgmr.msra.gmra.mrb[0].mxu0 %v240_v9 }
  0xf5   :  { %v229_v11 = vpop.f32.mrb[0].mxu0 }
  0xf6   :  { %v180_v12 = vadd.f32 %v229_v11, %v200_v10  ;;  %v141_v13 = vpop.f32.mrb[1].mxu0 }
  0xf7   :  { %v178_v14 = vadd.f32 %v200_v10, %v141_v13  ;;  %v230_v15 = vpop.f32.mrb[2].mxu0 }
  0xf8   :  { %184 = vst [vmem:[%s309_s3 + $0x10] sm:$0xff] %v180_v12  ;;  %v181_v16 = vadd.f32 %v230_v15, %v200_v10  ;;  %v144_v17 = vpop.f32.mrb[3].mxu0 }
  0xf9   :  { %182 = vst [vmem:[%s309_s3] sm:$0xff] %v178_v14  ;;  %v179_v18 = vadd.f32 %v200_v10, %v144_v17 }
  0xfa   :  { %185 = vst [vmem:[%s309_s3 + $0x18] sm:$0xff] %v181_v16 }
  0xfb   :  { %183 = vst [vmem:[%s309_s3 + $0x8] sm:$0xff] %v179_v18 }

// kernel: _lambda_.10
= control target key start
LH: loop header
LB: loop body
LE: loop exit
PB: predicated region body
PF: predicated region fallthrough
CT: control target
= control target key end

     0   :  { %s476_s1 = inlined_call_operand.vmem [shape: bf16[256,128], index: 1, kind: input, shape index: {}]   ;;  %s477_s0 = inlined_call_operand.vmem [shape: bf16[32,256], index: 0, kind: input, shape index: {}]   ;;  %s478_s2 = inlined_call_operand.vmem [shape: f32[1,128], index: 2, kind: input, shape index: {}]   ;;  %s479_s3 = inlined_call_operand.vmem [shape: f32[32,128], index: 3, kind: input, shape index: {}]   ;;  %s480_s4 = inlined_call_operand.vmem [shape: f32[32,128], index: 4, kind: output, shape index: {}]  }
   0x1   :  { %v342_v0 = vld [vmem:[%s476_s1 + $0x40] sm:$0xff]   ;;  %v344_v2 = vld [vmem:[%s476_s1 + $0x48] sm:$0xff]   ;;  %v346_v4 = vld [vmem:[%s476_s1 + $0x50] sm:$0xff]  }
   0x2   :  { %v343_v1 = vld [vmem:[%s476_s1] sm:$0xff]   ;;  %298 = vmatprep.subr.bf16.mxu0 %v342_v0  ;;  %326 = vmatprep.subr.bf16.mxu1 %v342_v0  ;;  %v345_v3 = vld [vmem:[%s476_s1 + $0x8] sm:$0xff]   ;;  %v347_v5 = vld [vmem:[%s476_s1 + $0x10] sm:$0xff]  }
   0x3   :  { %299 = vmatpush3.bf16.msra.mxu0 %v343_v1  ;;  %334 = vmatpush3.bf16.msra.mxu1 %v343_v1  ;;  %v348_v6 = vld [vmem:[%s476_s1 + $0x58] sm:$0xff]   ;;  %v350_v8 = vld [vmem:[%s476_s1 + $0x60] sm:$0xff]   ;;  %v352_v10 = vld [vmem:[%s476_s1 + $0x68] sm:$0xff]  }
   0x4   :  { %300 = vmatprep.subr.bf16.mxu0 %v344_v2  ;;  %327 = vmatprep.subr.bf16.mxu1 %v344_v2  ;;  %v349_v7 = vld [vmem:[%s476_s1 + $0x18] sm:$0xff]   ;;  %v351_v9 = vld [vmem:[%s476_s1 + $0x20] sm:$0xff]   ;;  %v353_v13 = vld [vmem:[%s476_s1 + $0x28] sm:$0xff]  }
   0x5   :  { %v360_v11 = vld [vmem:[%s477_s0 + $0x4] ss:$8 sps:$4 sm:$0xff]   ;;  %v363_v12 = vld [vmem:[%s477_s0 + $0x14] ss:$8 sps:$4 sm:$0xff]   ;;  %v358_v18 = vld [vmem:[%s477_s0] ss:$8 sps:$4 sm:$0xff]  }
   0x6   :  { %v354_v14 = vld [vmem:[%s476_s1 + $0x70] sm:$0xff]   ;;  %214 = vmatprep.mubr.bf16.mxu0 %v360_v11  ;;  %222 = vmatprep.mubr.bf16.mxu1 %v363_v12  ;;  %v356_v16 = vld [vmem:[%s476_s1 + $0x78] sm:$0xff]   ;;  %v297_v23 = vld [vmem:[%s478_s2] ss:$0 sm:$0xff] }
   0x7   :  { %301 = vmatpush3.bf16.msra.mxu0 %v345_v3  ;;  %335 = vmatpush3.bf16.msra.mxu1 %v345_v3  ;;  %v355_v15 = vld [vmem:[%s476_s1 + $0x30] sm:$0xff]   ;;  %v357_v17 = vld [vmem:[%s476_s1 + $0x38] sm:$0xff]   ;;  %v257_v35 = vld [vmem:[%s479_s3] sm:$0xff] }
   0x8   :  { %302 = vmatprep.subr.bf16.mxu0 %v346_v4  ;;  %328 = vmatprep.subr.bf16.mxu1 %v346_v4  ;;  %v361_v19 = vld [vmem:[%s477_s0 + $0x10] ss:$8 sps:$4 sm:$0xff]   ;;  %v258_v41 = vld [vmem:[%s479_s3 + $0x8] sm:$0xff] }
   0x9   :  { %v259_v36 = vld [vmem:[%s479_s3 + $0x10] sm:$0xff]  ;;  %v260_v42 = vld [vmem:[%s479_s3 + $0x18] sm:$0xff] }
   0xb   :  { %303 = vmatpush3.bf16.msra.mxu0 %v347_v5  ;;  %336 = vmatpush3.bf16.msra.mxu1 %v347_v5 }
   0xc   :  { %304 = vmatprep.subr.bf16.mxu0 %v348_v6  ;;  %329 = vmatprep.subr.bf16.mxu1 %v348_v6 }
   0xf   :  { %305 = vmatpush3.bf16.msra.mxu0 %v349_v7  ;;  %337 = vmatpush3.bf16.msra.mxu1 %v349_v7 }
  0x10   :  { %306 = vmatprep.subr.bf16.mxu0 %v350_v8  ;;  %330 = vmatprep.subr.bf16.mxu1 %v350_v8 }
  0x13   :  { %307 = vmatpush3.bf16.msra.mxu0 %v351_v9  ;;  %338 = vmatpush3.bf16.msra.mxu1 %v351_v9 }
  0x14   :  { %308 = vmatprep.subr.bf16.mxu0 %v352_v10  ;;  %331 = vmatprep.subr.bf16.mxu1 %v352_v10 }
  0x17   :  { %309 = vmatpush3.bf16.msra.mxu0 %v353_v13  ;;  %339 = vmatpush3.bf16.msra.mxu1 %v353_v13 }
  0x18   :  { %310 = vmatprep.subr.bf16.mxu0 %v354_v14  ;;  %332 = vmatprep.subr.bf16.mxu1 %v354_v14 }
  0x1b   :  { %311 = vmatpush3.bf16.msra.mxu0 %v355_v15  ;;  %340 = vmatpush3.bf16.msra.mxu1 %v355_v15 }
  0x1c   :  { %312 = vmatprep.subr.bf16.mxu0 %v356_v16  ;;  %333 = vmatprep.subr.bf16.mxu1 %v356_v16 }
  0x1f   :  { %313 = vmatpush3.bf16.msra.mxu0 %v357_v17  ;;  %341 = vmatpush3.bf16.msra.mxu1 %v357_v17 }
  0x22   :  { %215 = vmatmul.mubr.bf16.vlgmr.msra.gmra.mrb[0].mxu0 %v358_v18  ;;  %223 = vmatmul.mubr.bf16.vlgmr.msra.gmra.mrb[0].mxu1 %v361_v19 }
  0xf5   :  { %v314_v20 = vpop.f32.mrb[0].mxu0  ;;  %v320_v21 = vpop.f32.mrb[0].mxu1 }
  0xf6   :  { %v315_v22 = vpop.f32.mrb[1].mxu0  ;;  %v321_v24 = vpop.f32.mrb[1].mxu1 }
  0xf7   :  { %v316_v25 = vadd.f32 %v315_v22, %v314_v20  ;;  %v322_v26 = vadd.f32 %v321_v24, %v320_v21  ;;  %v317_v27 = vpop.f32.mrb[2].mxu0  ;;  %v323_v28 = vpop.f32.mrb[2].mxu1 }
  0xf8   :  { %v318_v29 = vpop.f32.mrb[3].mxu0  ;;  %v324_v30 = vpop.f32.mrb[3].mxu1 }
  0xf9   :  { %v253_v31 = vadd.f32 %v316_v25, %v297_v23  ;;  %v255_v32 = vadd.f32 %v322_v26, %v297_v23  ;;  %v319_v33 = vadd.f32 %v318_v29, %v317_v27  ;;  %v325_v34 = vadd.f32 %v324_v30, %v323_v28 }
  0xfb   :  { %v261_v37 = vmul.f32 0.5, %v253_v31  ;;  %v263_v38 = vmul.f32 0.5, %v255_v32  ;;  %v254_v39 = vadd.f32 %v319_v33, %v297_v23  ;;  %v256_v40 = vadd.f32 %v325_v34, %v297_v23 }
  0xfd   :  { %v265_v43 = vadd.f32 %v261_v37, %v257_v35  ;;  %v267_v44 = vadd.f32 %v263_v38, %v259_v36  ;;  %v262_v45 = vmul.f32 0.5, %v254_v39  ;;  %v264_v46 = vmul.f32 0.5, %v256_v40 }
  0xff   :  { %269 = vst [vmem:[%s480_s4] sm:$0xff] %v265_v43  ;;  %271 = vst [vmem:[%s480_s4 + $0x10] sm:$0xff] %v267_v44  ;;  %v266_v47 = vadd.f32 %v262_v45, %v258_v41  ;;  %v268_v48 = vadd.f32 %v264_v46, %v260_v42 }
 0x101   :  { %270 = vst [vmem:[%s480_s4 + $0x8] sm:$0xff] %v266_v47  ;;  %272 = vst [vmem:[%s480_s4 + $0x18] sm:$0xff] %v268_v48 }

// kernel: _lambda_.11
= control target key start
LH: loop header
LB: loop body
LE: loop exit
PB: predicated region body
PF: predicated region fallthrough
CT: control target
= control target key end

     0   :  { %s475_s1 = inlined_call_operand.vmem [shape: bf16[256,128], index: 1, kind: input, shape index: {}]   ;;  %s476_s0 = inlined_call_operand.vmem [shape: bf16[32,256], index: 0, kind: input, shape index: {}]   ;;  %s477_s2 = inlined_call_operand.vmem [shape: f32[1,128], index: 2, kind: input, shape index: {}]   ;;  %s478_s3 = inlined_call_operand.vmem [shape: f32[1,128], index: 3, kind: input, shape index: {}]   ;;  %s479_s4 = inlined_call_operand.vmem [shape: f32[32,128], index: 4, kind: output, shape index: {}]  }
   0x1   :  { %v350_v0 = vld [vmem:[%s475_s1 + $0x40] sm:$0xff]   ;;  %v352_v2 = vld [vmem:[%s475_s1 + $0x48] sm:$0xff]   ;;  %v354_v4 = vld [vmem:[%s475_s1 + $0x50] sm:$0xff]  }
   0x2   :  { %v351_v1 = vld [vmem:[%s475_s1] sm:$0xff]   ;;  %306 = vmatprep.subr.bf16.mxu0 %v350_v0  ;;  %334 = vmatprep.subr.bf16.mxu1 %v350_v0  ;;  %v353_v3 = vld [vmem:[%s475_s1 + $0x8] sm:$0xff]   ;;  %v355_v5 = vld [vmem:[%s475_s1 + $0x10] sm:$0xff]  }
   0x3   :  { %307 = vmatpush3.bf16.msra.mxu0 %v351_v1  ;;  %342 = vmatpush3.bf16.msra.mxu1 %v351_v1  ;;  %v356_v6 = vld [vmem:[%s475_s1 + $0x58] sm:$0xff]   ;;  %v358_v8 = vld [vmem:[%s475_s1 + $0x60] sm:$0xff]   ;;  %v360_v10 = vld [vmem:[%s475_s1 + $0x68] sm:$0xff]  }
   0x4   :  { %308 = vmatprep.subr.bf16.mxu0 %v352_v2  ;;  %335 = vmatprep.subr.bf16.mxu1 %v352_v2  ;;  %v357_v7 = vld [vmem:[%s475_s1 + $0x18] sm:$0xff]   ;;  %v359_v9 = vld [vmem:[%s475_s1 + $0x20] sm:$0xff]   ;;  %v361_v13 = vld [vmem:[%s475_s1 + $0x28] sm:$0xff]  }
   0x5   :  { %v368_v11 = vld [vmem:[%s476_s0 + $0x4] ss:$8 sps:$4 sm:$0xff]   ;;  %v371_v12 = vld [vmem:[%s476_s0 + $0x14] ss:$8 sps:$4 sm:$0xff]   ;;  %v366_v18 = vld [vmem:[%s476_s0] ss:$8 sps:$4 sm:$0xff]  }
   0x6   :  { %v362_v14 = vld [vmem:[%s475_s1 + $0x70] sm:$0xff]   ;;  %214 = vmatprep.mubr.bf16.mxu0 %v368_v11  ;;  %222 = vmatprep.mubr.bf16.mxu1 %v371_v12  ;;  %v364_v16 = vld [vmem:[%s475_s1 + $0x78] sm:$0xff]   ;;  %v304_v23 = vld [vmem:[%s477_s2] ss:$0 sm:$0xff] }
   0x7   :  { %309 = vmatpush3.bf16.msra.mxu0 %v353_v3  ;;  %343 = vmatpush3.bf16.msra.mxu1 %v353_v3  ;;  %v363_v15 = vld [vmem:[%s475_s1 + $0x30] sm:$0xff]   ;;  %v365_v17 = vld [vmem:[%s475_s1 + $0x38] sm:$0xff]   ;;  %v305_v29 = vld [vmem:[%s478_s3] ss:$0 sm:$0xff] }
   0x8   :  { %310 = vmatprep.subr.bf16.mxu0 %v354_v4  ;;  %336 = vmatprep.subr.bf16.mxu1 %v354_v4  ;;  %v369_v19 = vld [vmem:[%s476_s0 + $0x10] ss:$8 sps:$4 sm:$0xff]  }
   0xb   :  { %311 = vmatpush3.bf16.msra.mxu0 %v355_v5  ;;  %344 = vmatpush3.bf16.msra.mxu1 %v355_v5 }
   0xc   :  { %312 = vmatprep.subr.bf16.mxu0 %v356_v6  ;;  %337 = vmatprep.subr.bf16.mxu1 %v356_v6 }
   0xf   :  { %313 = vmatpush3.bf16.msra.mxu0 %v357_v7  ;;  %345 = vmatpush3.bf16.msra.mxu1 %v357_v7 }
  0x10   :  { %314 = vmatprep.subr.bf16.mxu0 %v358_v8  ;;  %338 = vmatprep.subr.bf16.mxu1 %v358_v8 }
  0x13   :  { %315 = vmatpush3.bf16.msra.mxu0 %v359_v9  ;;  %346 = vmatpush3.bf16.msra.mxu1 %v359_v9 }
  0x14   :  { %316 = vmatprep.subr.bf16.mxu0 %v360_v10  ;;  %339 = vmatprep.subr.bf16.mxu1 %v360_v10 }
  0x17   :  { %317 = vmatpush3.bf16.msra.mxu0 %v361_v13  ;;  %347 = vmatpush3.bf16.msra.mxu1 %v361_v13 }
  0x18   :  { %318 = vmatprep.subr.bf16.mxu0 %v362_v14  ;;  %340 = vmatprep.subr.bf16.mxu1 %v362_v14 }
  0x1b   :  { %319 = vmatpush3.bf16.msra.mxu0 %v363_v15  ;;  %348 = vmatpush3.bf16.msra.mxu1 %v363_v15 }
  0x1c   :  { %320 = vmatprep.subr.bf16.mxu0 %v364_v16  ;;  %341 = vmatprep.subr.bf16.mxu1 %v364_v16 }
  0x1f   :  { %321 = vmatpush3.bf16.msra.mxu0 %v365_v17  ;;  %349 = vmatpush3.bf16.msra.mxu1 %v365_v17 }
  0x22   :  { %215 = vmatmul.mubr.bf16.vlgmr.msra.gmra.mrb[0].mxu0 %v366_v18  ;;  %223 = vmatmul.mubr.bf16.vlgmr.msra.gmra.mrb[0].mxu1 %v369_v19 }
  0xf5   :  { %v322_v20 = vpop.f32.mrb[0].mxu0  ;;  %v328_v21 = vpop.f32.mrb[0].mxu1 }
  0xf6   :  { %v323_v22 = vpop.f32.mrb[1].mxu0  ;;  %v329_v24 = vpop.f32.mrb[1].mxu1 }
  0xf7   :  { %v324_v25 = vadd.f32 %v323_v22, %v322_v20  ;;  %v330_v26 = vadd.f32 %v329_v24, %v328_v21  ;;  %v325_v27 = vpop.f32.mrb[2].mxu0  ;;  %v331_v28 = vpop.f32.mrb[2].mxu1 }
  0xf8   :  { %v326_v30 = vpop.f32.mrb[3].mxu0  ;;  %v332_v31 = vpop.f32.mrb[3].mxu1 }
  0xf9   :  { %v253_v32 = vadd.f32 %v324_v25, %v304_v23  ;;  %v255_v33 = vadd.f32 %v330_v26, %v304_v23  ;;  %v327_v34 = vadd.f32 %v326_v30, %v325_v27  ;;  %v333_v35 = vadd.f32 %v332_v31, %v331_v28 }
  0xfb   :  { %vm257_vm0 = vcmp.ge.f32.partialorder %v253_v32, 0.0  ;;  %v268_v36 = vmul.f32 %v305_v29, %v253_v32  ;;  %vm259_vm1 = vcmp.ge.f32.partialorder %v255_v33, 0.0  ;;  %v270_v37 = vmul.f32 %v305_v29, %v255_v33 }
  0xfc   :  { %v254_v38 = vadd.f32 %v327_v34, %v304_v23  ;;  %v256_v39 = vadd.f32 %v333_v35, %v304_v23 }
  0xfd   :  { %v272_v40 = vsel %vm257_vm0, %v253_v32, %v268_v36  ;;  %v274_v41 = vsel %vm259_vm1, %v255_v33, %v270_v37 }
  0xfe   :  { %276 = vst [vmem:[%s479_s4] sm:$0xff] %v272_v40  ;;  %278 = vst [vmem:[%s479_s4 + $0x10] sm:$0xff] %v274_v41  ;;  %vm258_vm2 = vcmp.ge.f32.partialorder %v254_v38, 0.0  ;;  %v269_v42 = vmul.f32 %v305_v29, %v254_v38  ;;  %vm260_vm3 = vcmp.ge.f32.partialorder %v256_v39, 0.0  ;;  %v271_v43 = vmul.f32 %v305_v29, %v256_v39 }
 0x100   :  { %v273_v44 = vsel %vm258_vm2, %v254_v38, %v269_v42  ;;  %v275_v45 = vsel %vm260_vm3, %v256_v39, %v271_v43 }
 0x101   :  { %277 = vst [vmem:[%s479_s4 + $0x8] sm:$0xff] %v273_v44  ;;  %279 = vst [vmem:[%s479_s4 + $0x18] sm:$0xff] %v275_v45 }

// kernel: _lambda_.12
= control target key start
LH: loop header
LB: loop body
LE: loop exit
PB: predicated region body
PF: predicated region fallthrough
CT: control target
= control target key end

     0   :  { %s472_s1 = inlined_call_operand.vmem [shape: bf16[256,128], index: 1, kind: input, shape index: {}]   ;;  %s473_s0 = inlined_call_operand.vmem [shape: bf16[32,256], index: 0, kind: input, shape index: {}]   ;;  %s474_s2 = inlined_call_operand.vmem [shape: f32[1,128], index: 2, kind: input, shape index: {}]   ;;  %s475_s3 = inlined_call_operand.vmem [shape: f32[32,128], index: 3, kind: input, shape index: {}]   ;;  %s476_s4 = inlined_call_operand.vmem [shape: f32[32,128], index: 4, kind: output, shape index: {}]  }
   0x1   :  { %v338_v0 = vld [vmem:[%s472_s1 + $0x40] sm:$0xff]   ;;  %v340_v2 = vld [vmem:[%s472_s1 + $0x48] sm:$0xff]   ;;  %v342_v4 = vld [vmem:[%s472_s1 + $0x50] sm:$0xff]  }
   0x2   :  { %v339_v1 = vld [vmem:[%s472_s1] sm:$0xff]   ;;  %294 = vmatprep.subr.bf16.mxu0 %v338_v0  ;;  %322 = vmatprep.subr.bf16.mxu1 %v338_v0  ;;  %v341_v3 = vld [vmem:[%s472_s1 + $0x8] sm:$0xff]   ;;  %v343_v5 = vld [vmem:[%s472_s1 + $0x10] sm:$0xff]  }
   0x3   :  { %295 = vmatpush3.bf16.msra.mxu0 %v339_v1  ;;  %330 = vmatpush3.bf16.msra.mxu1 %v339_v1  ;;  %v344_v6 = vld [vmem:[%s472_s1 + $0x58] sm:$0xff]   ;;  %v346_v8 = vld [vmem:[%s472_s1 + $0x60] sm:$0xff]   ;;  %v348_v10 = vld [vmem:[%s472_s1 + $0x68] sm:$0xff]  }
   0x4   :  { %296 = vmatprep.subr.bf16.mxu0 %v340_v2  ;;  %323 = vmatprep.subr.bf16.mxu1 %v340_v2  ;;  %v345_v7 = vld [vmem:[%s472_s1 + $0x18] sm:$0xff]   ;;  %v347_v9 = vld [vmem:[%s472_s1 + $0x20] sm:$0xff]   ;;  %v349_v13 = vld [vmem:[%s472_s1 + $0x28] sm:$0xff]  }
   0x5   :  { %v356_v11 = vld [vmem:[%s473_s0 + $0x4] ss:$8 sps:$4 sm:$0xff]   ;;  %v359_v12 = vld [vmem:[%s473_s0 + $0x14] ss:$8 sps:$4 sm:$0xff]   ;;  %v354_v18 = vld [vmem:[%s473_s0] ss:$8 sps:$4 sm:$0xff]  }
   0x6   :  { %v350_v14 = vld [vmem:[%s472_s1 + $0x70] sm:$0xff]   ;;  %214 = vmatprep.mubr.bf16.mxu0 %v356_v11  ;;  %222 = vmatprep.mubr.bf16.mxu1 %v359_v12  ;;  %v352_v16 = vld [vmem:[%s472_s1 + $0x78] sm:$0xff]   ;;  %v293_v23 = vld [vmem:[%s474_s2] ss:$0 sm:$0xff] }
   0x7   :  { %297 = vmatpush3.bf16.msra.mxu0 %v341_v3  ;;  %331 = vmatpush3.bf16.msra.mxu1 %v341_v3  ;;  %v351_v15 = vld [vmem:[%s472_s1 + $0x30] sm:$0xff]   ;;  %v353_v17 = vld [vmem:[%s472_s1 + $0x38] sm:$0xff]   ;;  %v257_v29 = vld [vmem:[%s475_s3] sm:$0xff] }
   0x8   :  { %298 = vmatprep.subr.bf16.mxu0 %v342_v4  ;;  %324 = vmatprep.subr.bf16.mxu1 %v342_v4  ;;  %v357_v19 = vld [vmem:[%s473_s0 + $0x10] ss:$8 sps:$4 sm:$0xff]   ;;  %v258_v37 = vld [vmem:[%s475_s3 + $0x8] sm:$0xff] }
   0x9   :  { %v259_v30 = vld [vmem:[%s475_s3 + $0x10] sm:$0xff]  ;;  %v260_v38 = vld [vmem:[%s475_s3 + $0x18] sm:$0xff] }
   0xb   :  { %299 = vmatpush3.bf16.msra.mxu0 %v343_v5  ;;  %332 = vmatpush3.bf16.msra.mxu1 %v343_v5 }
   0xc   :  { %300 = vmatprep.subr.bf16.mxu0 %v344_v6  ;;  %325 = vmatprep.subr.bf16.mxu1 %v344_v6 }
   0xf   :  { %301 = vmatpush3.bf16.msra.mxu0 %v345_v7  ;;  %333 = vmatpush3.bf16.msra.mxu1 %v345_v7 }
  0x10   :  { %302 = vmatprep.subr.bf16.mxu0 %v346_v8  ;;  %326 = vmatprep.subr.bf16.mxu1 %v346_v8 }
  0x13   :  { %303 = vmatpush3.bf16.msra.mxu0 %v347_v9  ;;  %334 = vmatpush3.bf16.msra.mxu1 %v347_v9 }
  0x14   :  { %304 = vmatprep.subr.bf16.mxu0 %v348_v10  ;;  %327 = vmatprep.subr.bf16.mxu1 %v348_v10 }
  0x17   :  { %305 = vmatpush3.bf16.msra.mxu0 %v349_v13  ;;  %335 = vmatpush3.bf16.msra.mxu1 %v349_v13 }
  0x18   :  { %306 = vmatprep.subr.bf16.mxu0 %v350_v14  ;;  %328 = vmatprep.subr.bf16.mxu1 %v350_v14 }
  0x1b   :  { %307 = vmatpush3.bf16.msra.mxu0 %v351_v15  ;;  %336 = vmatpush3.bf16.msra.mxu1 %v351_v15 }
  0x1c   :  { %308 = vmatprep.subr.bf16.mxu0 %v352_v16  ;;  %329 = vmatprep.subr.bf16.mxu1 %v352_v16 }
  0x1f   :  { %309 = vmatpush3.bf16.msra.mxu0 %v353_v17  ;;  %337 = vmatpush3.bf16.msra.mxu1 %v353_v17 }
  0x22   :  { %215 = vmatmul.mubr.bf16.vlgmr.msra.gmra.mrb[0].mxu0 %v354_v18  ;;  %223 = vmatmul.mubr.bf16.vlgmr.msra.gmra.mrb[0].mxu1 %v357_v19 }
  0xf5   :  { %v310_v20 = vpop.f32.mrb[0].mxu0  ;;  %v316_v21 = vpop.f32.mrb[0].mxu1 }
  0xf6   :  { %v311_v22 = vpop.f32.mrb[1].mxu0  ;;  %v317_v24 = vpop.f32.mrb[1].mxu1 }
  0xf7   :  { %v312_v25 = vadd.f32 %v311_v22, %v310_v20  ;;  %v318_v26 = vadd.f32 %v317_v24, %v316_v21  ;;  %v313_v27 = vpop.f32.mrb[2].mxu0  ;;  %v319_v28 = vpop.f32.mrb[2].mxu1 }
  0xf8   :  { %v314_v31 = vpop.f32.mrb[3].mxu0  ;;  %v320_v32 = vpop.f32.mrb[3].mxu1 }
  0xf9   :  { %v253_v33 = vadd.f32 %v312_v25, %v293_v23  ;;  %v255_v34 = vadd.f32 %v318_v26, %v293_v23  ;;  %v315_v35 = vadd.f32 %v314_v31, %v313_v27  ;;  %v321_v36 = vadd.f32 %v320_v32, %v319_v28 }
  0xfb   :  { %v261_v39 = vadd.f32 %v257_v29, %v253_v33  ;;  %v263_v40 = vadd.f32 %v259_v30, %v255_v34  ;;  %v254_v41 = vadd.f32 %v315_v35, %v293_v23  ;;  %v256_v42 = vadd.f32 %v321_v36, %v293_v23 }
  0xfd   :  { %265 = vst [vmem:[%s476_s4] sm:$0xff] %v261_v39  ;;  %267 = vst [vmem:[%s476_s4 + $0x10] sm:$0xff] %v263_v40  ;;  %v262_v43 = vadd.f32 %v258_v37, %v254_v41  ;;  %v264_v44 = vadd.f32 %v260_v38, %v256_v42 }
  0xff   :  { %266 = vst [vmem:[%s476_s4 + $0x8] sm:$0xff] %v262_v43  ;;  %268 = vst [vmem:[%s476_s4 + $0x18] sm:$0xff] %v264_v44 }

// kernel: _lambda_.13
= control target key start
LH: loop header
LB: loop body
LE: loop exit
PB: predicated region body
PF: predicated region fallthrough
CT: control target
= control target key end

     0   :  { %vm2424_vm0 = vmmov 0   ;;  %s3016_s1 = inlined_call_operand.vmem [shape: bf16[2048,128], index: 1, kind: input, shape index: {}]   ;;  %s3017_s0 = inlined_call_operand.vmem [shape: bf16[8,2048], index: 0, kind: input, shape index: {}]   ;;  %s3018_s4 = inlined_call_operand.vmem [shape: bf16[128,128], index: 4, kind: input, shape index: {}]   ;;  %s3019_s7 = inlined_call_operand.vmem [shape: bf16[128,128], index: 7, kind: input, shape index: {}]   ;;  %s3020_s2 = inlined_call_operand.vmem [shape: f32[1,128], index: 2, kind: input, shape index: {}]   ;;  %s3021_s3 = inlined_call_operand.vmem [shape: f32[1,128], index: 3, kind: input, shape index: {}, may-alias: {3,6}]   ;;  %s3022_s9 = inlined_call_operand.vmem [shape: bf16[128,128], index: 9, kind: input, shape index: {}]   ;;  %s3023_s5 = inlined_call_operand.vmem [shape: f32[1,128], index: 5, kind: input, shape index: {}]   ;;  %s3024_s6 = inlined_call_operand.vmem [shape: f32[1,128], index: 6, kind: input, shape index: {}, may-alias: {3,6}]   ;;  %s3025_s8 = inlined_call_operand.vmem [shape: f32[1,128], index: 8, kind: input, shape index: {}]   ;;  %s3026_s10 = inlined_call_operand.vmem [shape: f32[1,128], index: 10, kind: input, shape index: {}]   ;;  %s3027_s11 = inlined_call_operand.vmem [shape: f32[8,128], index: 11, kind: output, shape index: {}]  }
   0x1   :  { %v2255_v0 = vld [vmem:[%s3016_s1 + $0x40] sm:$0xff]   ;;  %v2259_v4 = vld [vmem:[%s3016_s1 + $0x48] sm:$0xff]   ;;  %v2263_v8 = vld [vmem:[%s3016_s1 + $0x50] sm:$0xff]  }
   0x2   :  { %v2256_v1 = vld [vmem:[%s3016_s1 + $0xc0] sm:$0xff]   ;;  %1990 = vmatprep.subr.bf16.mxu0 %v2255_v0  ;;  %v2260_v5 = vld [vmem:[%s3016_s1 + $0xc8] sm:$0xff]   ;;  %v2264_v9 = vld [vmem:[%s3016_s1 + $0xd0] sm:$0xff]  }
   0x3   :  { %v2257_v2 = vld [vmem:[%s3016_s1] sm:$0xff]   ;;  %2012 = vmatprep.subr.bf16.mxu1 %v2256_v1  ;;  %v2261_v6 = vld [vmem:[%s3016_s1 + $0x8] sm:$0xff]   ;;  %v2265_v10 = vld [vmem:[%s3016_s1 + $0x10] sm:$0xff]  }
   0x4   :  { %v2258_v3 = vld [vmem:[%s3016_s1 + $0x80] sm:$0xff]   ;;  %1991 = vmatpush3.bf16.msra.mxu0 %v2257_v2  ;;  %v2262_v7 = vld [vmem:[%s3016_s1 + $0x88] sm:$0xff]   ;;  %v2266_v11 = vld [vmem:[%s3016_s1 + $0x90] sm:$0xff]  }
   0x5   :  { %2013 = vmatpush3.bf16.msra.mxu1 %v2258_v3  ;;  %1992 = vmatprep.subr.bf16.mxu0 %v2259_v4  ;;  %v2267_v12 = vld [vmem:[%s3016_s1 + $0x58] sm:$0xff]   ;;  %v2271_v16 = vld [vmem:[%s3016_s1 + $0x60] sm:$0xff]   ;;  %v2275_v20 = vld [vmem:[%s3016_s1 + $0x68] sm:$0xff]  }
   0x6   :  { %2014 = vmatprep.subr.bf16.mxu1 %v2260_v5  ;;  %v2268_v13 = vld [vmem:[%s3016_s1 + $0xd8] sm:$0xff]   ;;  %v2272_v17 = vld [vmem:[%s3016_s1 + $0xe0] sm:$0xff]   ;;  %v2276_v21 = vld [vmem:[%s3016_s1 + $0xe8] sm:$0xff]  }
   0x7   :  { %v2269_v14 = vld [vmem:[%s3016_s1 + $0x18] sm:$0xff]   ;;  %v2273_v18 = vld [vmem:[%s3016_s1 + $0x20] sm:$0xff]   ;;  %v2277_v22 = vld [vmem:[%s3016_s1 + $0x28] sm:$0xff]  }
   0x8   :  { %1993 = vmatpush3.bf16.msra.mxu0 %v2261_v6  ;;  %v2270_v15 = vld [vmem:[%s3016_s1 + $0x98] sm:$0xff]   ;;  %v2274_v19 = vld [vmem:[%s3016_s1 + $0xa0] sm:$0xff]   ;;  %v2278_v23 = vld [vmem:[%s3016_s1 + $0xa8] sm:$0xff]  }
   0x9   :  { %2015 = vmatpush3.bf16.msra.mxu1 %v2262_v7  ;;  %1994 = vmatprep.subr.bf16.mxu0 %v2263_v8  ;;  %v2279_v24 = vld [vmem:[%s3016_s1 + $0x70] sm:$0xff]   ;;  %v2283_v28 = vld [vmem:[%s3016_s1 + $0x78] sm:$0xff]   ;;  %v39_v32 = vld [vmem:[%s3017_s0] sm:$0xff] }
   0xa   :  { %2016 = vmatprep.subr.bf16.mxu1 %v2264_v9  ;;  %v2280_v25 = vld [vmem:[%s3016_s1 + $0xf0] sm:$0xff]   ;;  %v2284_v29 = vld [vmem:[%s3016_s1 + $0xf8] sm:$0xff]   ;;  %v40_v33 = vld [vmem:[%s3017_s0 + $0x8] sm:$0xff]  ;;  %v1817_v34 = vcombine.low %v39_v32, %v39_v32  ;;  %v1818_v35 = vcombine.high %v39_v32, %v39_v32 }
   0xb   :  { %v2281_v26 = vld [vmem:[%s3016_s1 + $0x30] sm:$0xff]   ;;  %v2285_v30 = vld [vmem:[%s3016_s1 + $0x38] sm:$0xff]   ;;  %v1819_v36 = vcombine.low %v40_v33, %v40_v33  ;;  %v1820_v37 = vcombine.high %v40_v33, %v40_v33  ;;  %v2291_v38 = vld [vmem:[%s3016_s1 + $0x140] sm:$0xff]  }
   0xc   :  { %1995 = vmatpush3.bf16.msra.mxu0 %v2265_v10  ;;  %v2282_v27 = vld [vmem:[%s3016_s1 + $0xb0] sm:$0xff]   ;;  %v2286_v31 = vld [vmem:[%s3016_s1 + $0xb8] sm:$0xff]   ;;  %v2292_v39 = vld [vmem:[%s3016_s1 + $0x1c0] sm:$0xff]   ;;  %1166 = vmatprep.mubr.bf16.mxu0 %v1818_v35 }
   0xd   :  { %2017 = vmatpush3.bf16.msra.mxu1 %v2266_v11  ;;  %1996 = vmatprep.subr.bf16.mxu0 %v2267_v12  ;;  %v2293_v40 = vld [vmem:[%s3016_s1 + $0x100] sm:$0xff]   ;;  %v2295_v42 = vld [vmem:[%s3016_s1 + $0x148] sm:$0xff]   ;;  %v2299_v46 = vld [vmem:[%s3016_s1 + $0x150] sm:$0xff]  }
   0xe   :  { %2018 = vmatprep.subr.bf16.mxu1 %v2268_v13  ;;  %1206 = vmatprep.mubr.bf16.mxu1 %v1820_v37  ;;  %v2294_v41 = vld [vmem:[%s3016_s1 + $0x180] sm:$0xff]   ;;  %v2296_v43 = vld [vmem:[%s3016_s1 + $0x1c8] sm:$0xff]   ;;  %v2300_v47 = vld [vmem:[%s3016_s1 + $0x1d0] sm:$0xff]  }
   0xf   :  { %v2297_v44 = vld [vmem:[%s3016_s1 + $0x108] sm:$0xff]   ;;  %v2301_v48 = vld [vmem:[%s3016_s1 + $0x110] sm:$0xff]   ;;  %v2303_v50 = vld [vmem:[%s3016_s1 + $0x158] sm:$0xff]  }
  0x10   :  { %1997 = vmatpush3.bf16.msra.mxu0 %v2269_v14  ;;  %v2298_v45 = vld [vmem:[%s3016_s1 + $0x188] sm:$0xff]   ;;  %v2302_v49 = vld [vmem:[%s3016_s1 + $0x190] sm:$0xff]   ;;  %v2304_v51 = vld [vmem:[%s3016_s1 + $0x1d8] sm:$0xff]  }
  0x11   :  { %2019 = vmatpush3.bf16.msra.mxu1 %v2270_v15  ;;  %1998 = vmatprep.subr.bf16.mxu0 %v2271_v16  ;;  %v2305_v52 = vld [vmem:[%s3016_s1 + $0x118] sm:$0xff]   ;;  %v2307_v54 = vld [vmem:[%s3016_s1 + $0x160] sm:$0xff]   ;;  %v2311_v58 = vld [vmem:[%s3016_s1 + $0x168] sm:$0xff]  }
  0x12   :  { %2020 = vmatprep.subr.bf16.mxu1 %v2272_v17  ;;  %v2306_v53 = vld [vmem:[%s3016_s1 + $0x198] sm:$0xff]   ;;  %v2308_v55 = vld [vmem:[%s3016_s1 + $0x1e0] sm:$0xff]   ;;  %v2312_v59 = vld [vmem:[%s3016_s1 + $0x1e8] sm:$0xff]  }
  0x13   :  { %v2309_v56 = vld [vmem:[%s3016_s1 + $0x120] sm:$0xff]   ;;  %v2313_v60 = vld [vmem:[%s3016_s1 + $0x128] sm:$0xff]   ;;  %v2315_v62 = vld [vmem:[%s3016_s1 + $0x170] sm:$0xff]  }
  0x14   :  { %1999 = vmatpush3.bf16.msra.mxu0 %v2273_v18  ;;  %v2310_v57 = vld [vmem:[%s3016_s1 + $0x1a0] sm:$0xff]   ;;  %v2314_v61 = vld [vmem:[%s3016_s1 + $0x1a8] sm:$0xff]   ;;  %v2316_v63 = vld [vmem:[%s3016_s1 + $0x1f0] sm:$0xff]  }
  0x15   :  { %2021 = vmatpush3.bf16.msra.mxu1 %v2274_v19  ;;  %2000 = vmatprep.subr.bf16.mxu0 %v2275_v20  ;;  %v2317_v0 = vld [vmem:[%s3016_s1 + $0x130] sm:$0xff]   ;;  %v2319_v2 = vld [vmem:[%s3016_s1 + $0x178] sm:$0xff]   ;;  %v2327_v12 = vld [vmem:[%s3016_s1 + $0x240] sm:$0xff]  }
  0x16   :  { %2022 = vmatprep.subr.bf16.mxu1 %v2276_v21  ;;  %v2318_v1 = vld [vmem:[%s3016_s1 + $0x1b0] sm:$0xff]   ;;  %v2320_v3 = vld [vmem:[%s3016_s1 + $0x1f8] sm:$0xff]   ;;  %v2328_v13 = vld [vmem:[%s3016_s1 + $0x2c0] sm:$0xff]  }
  0x17   :  { %v2321_v4 = vld [vmem:[%s3016_s1 + $0x138] sm:$0xff]   ;;  %v41_v6 = vld [vmem:[%s3017_s0 + $0x10] sm:$0xff]  ;;  %v2329_v14 = vld [vmem:[%s3016_s1 + $0x200] sm:$0xff]  }
  0x18   :  { %2001 = vmatpush3.bf16.msra.mxu0 %v2277_v22  ;;  %v2322_v5 = vld [vmem:[%s3016_s1 + $0x1b8] sm:$0xff]   ;;  %v1821_v7 = vcombine.low %v41_v6, %v41_v6  ;;  %v1822_v8 = vcombine.high %v41_v6, %v41_v6  ;;  %v2330_v15 = vld [vmem:[%s3016_s1 + $0x280] sm:$0xff]   ;;  %v2331_v16 = vld [vmem:[%s3016_s1 + $0x248] sm:$0xff]  }
  0x19   :  { %2023 = vmatpush3.bf16.msra.mxu1 %v2278_v23  ;;  %2002 = vmatprep.subr.bf16.mxu0 %v2279_v24  ;;  %v42_v9 = vld [vmem:[%s3017_s0 + $0x18] sm:$0xff]  ;;  %v2332_v17 = vld [vmem:[%s3016_s1 + $0x2c8] sm:$0xff]   ;;  %v2335_v20 = vld [vmem:[%s3016_s1 + $0x250] sm:$0xff]  }
  0x1a   :  { %2024 = vmatprep.subr.bf16.mxu1 %v2280_v25  ;;  %v1823_v10 = vcombine.low %v42_v9, %v42_v9  ;;  %v1824_v11 = vcombine.high %v42_v9, %v42_v9  ;;  %v2333_v18 = vld [vmem:[%s3016_s1 + $0x208] sm:$0xff]   ;;  %v2336_v21 = vld [vmem:[%s3016_s1 + $0x2d0] sm:$0xff]   ;;  %v2339_v24 = vld [vmem:[%s3016_s1 + $0x258] sm:$0xff]  }
  0x1b   :  { %v2334_v19 = vld [vmem:[%s3016_s1 + $0x288] sm:$0xff]   ;;  %v2337_v22 = vld [vmem:[%s3016_s1 + $0x210] sm:$0xff]   ;;  %v2340_v25 = vld [vmem:[%s3016_s1 + $0x2d8] sm:$0xff]  }
  0x1c   :  { %2003 = vmatpush3.bf16.msra.mxu0 %v2281_v26  ;;  %v2338_v23 = vld [vmem:[%s3016_s1 + $0x290] sm:$0xff]   ;;  %v2341_v26 = vld [vmem:[%s3016_s1 + $0x218] sm:$0xff]   ;;  %v2347_v32 = vld [vmem:[%s3016_s1 + $0x268] sm:$0xff]  }
  0x1d   :  { %2025 = vmatpush3.bf16.msra.mxu1 %v2282_v27  ;;  %2004 = vmatprep.subr.bf16.mxu0 %v2283_v28  ;;  %v2342_v27 = vld [vmem:[%s3016_s1 + $0x298] sm:$0xff]   ;;  %v2343_v28 = vld [vmem:[%s3016_s1 + $0x260] sm:$0xff]   ;;  %v2348_v33 = vld [vmem:[%s3016_s1 + $0x2e8] sm:$0xff]  }
  0x1e   :  { %2026 = vmatprep.subr.bf16.mxu1 %v2284_v29  ;;  %v2344_v29 = vld [vmem:[%s3016_s1 + $0x2e0] sm:$0xff]   ;;  %v2350_v35 = vld [vmem:[%s3016_s1 + $0x2a8] sm:$0xff]   ;;  %v2352_v37 = vld [vmem:[%s3016_s1 + $0x2f0] sm:$0xff]  }
  0x1f   :  { %v2383_v6 = vld [vmem:[%s3016_s1 + $0x368] sm:$0xff]  }
  0x20   :  { %2005 = vmatpush3.bf16.msra.mxu0 %v2285_v30  ;;  %v2345_v30 = vld [vmem:[%s3016_s1 + $0x220] sm:$0xff]   ;;  %v2386_v9 = vld [vmem:[%s3016_s1 + $0x3a8] sm:$0xff]  }
  0x21   :  { %2027 = vmatpush3.bf16.msra.mxu1 %v2286_v31  ;;  %2034 = vmatprep.subr.bf16.mxu0 %v2291_v38  ;;  %v2346_v31 = vld [vmem:[%s3016_s1 + $0x2a0] sm:$0xff]   ;;  %v2353_v38 = vld [vmem:[%s3016_s1 + $0x230] sm:$0xff]  }
  0x22   :  { %2056 = vmatprep.subr.bf16.mxu1 %v2292_v39  ;;  %v2354_v39 = vld [vmem:[%s3016_s1 + $0x2b0] sm:$0xff]  }
  0x23   :  { %1167 = vmatmul.mubr.bf16.vlgmr.msra.gmra.mrb[0].mxu0 %v1817_v34  ;;  %v2349_v34 = vld [vmem:[%s3016_s1 + $0x228] sm:$0xff]  }
  0x24   :  { %1207 = vmatmul.mubr.bf16.vlgmr.msra.gmra.mrb[0].mxu1 %v1819_v36  ;;  %2035 = vmatpush3.bf16.msra.mxu0 %v2293_v40  ;;  %v2351_v36 = vld [vmem:[%s3016_s1 + $0x270] sm:$0xff]   ;;  %v2355_v40 = vld [vmem:[%s3016_s1 + $0x278] sm:$0xff]  }
  0x25   :  { %2057 = vmatpush3.bf16.msra.mxu1 %v2294_v41  ;;  %2036 = vmatprep.subr.bf16.mxu0 %v2295_v42  ;;  %v2356_v41 = vld [vmem:[%s3016_s1 + $0x2f8] sm:$0xff]  }
  0x26   :  { %2058 = vmatprep.subr.bf16.mxu1 %v2296_v43  ;;  %1246 = vmatprep.mubr.bf16.mxu0 %v1822_v8  ;;  %v2357_v42 = vld [vmem:[%s3016_s1 + $0x238] sm:$0xff]   ;;  %v2385_v8 = vld [vmem:[%s3016_s1 + $0x328] sm:$0xff]  }
  0x27   :  { %1286 = vmatprep.mubr.bf16.mxu1 %v1824_v11  ;;  %v2358_v43 = vld [vmem:[%s3016_s1 + $0x2b8] sm:$0xff]   ;;  %v2388_v11 = vld [vmem:[%s3016_s1 + $0x3f0] sm:$0xff]  }
  0x28   :  { %2037 = vmatpush3.bf16.msra.mxu0 %v2297_v44  ;;  %v43_v44 = vld [vmem:[%s3017_s0 + $0x20] sm:$0xff] }
  0x29   :  { %2059 = vmatpush3.bf16.msra.mxu1 %v2298_v45  ;;  %2038 = vmatprep.subr.bf16.mxu0 %v2299_v46  ;;  %v44_v45 = vld [vmem:[%s3017_s0 + $0x28] sm:$0xff]  ;;  %v1825_v46 = vcombine.low %v43_v44, %v43_v44 }
  0x2a   :  { %2060 = vmatprep.subr.bf16.mxu1 %v2300_v47  ;;  %v1826_v47 = vcombine.high %v43_v44, %v43_v44 }
  0x2c   :  { %2039 = vmatpush3.bf16.msra.mxu0 %v2301_v48  ;;  %v1827_v48 = vcombine.low %v44_v45, %v44_v45 }
  0x2d   :  { %2061 = vmatpush3.bf16.msra.mxu1 %v2302_v49  ;;  %2040 = vmatprep.subr.bf16.mxu0 %v2303_v50  ;;  %v1828_v49 = vcombine.high %v44_v45, %v44_v45  ;;  %v2363_v50 = vld [vmem:[%s3016_s1 + $0x340] sm:$0xff]  }
  0x2e   :  { %2062 = vmatprep.subr.bf16.mxu1 %v2304_v51  ;;  %v2364_v51 = vld [vmem:[%s3016_s1 + $0x3c0] sm:$0xff]  }
  0x30   :  { %2041 = vmatpush3.bf16.msra.mxu0 %v2305_v52  ;;  %v2365_v52 = vld [vmem:[%s3016_s1 + $0x300] sm:$0xff]  }
  0x31   :  { %2063 = vmatpush3.bf16.msra.mxu1 %v2306_v53  ;;  %2042 = vmatprep.subr.bf16.mxu0 %v2307_v54  ;;  %v2366_v53 = vld [vmem:[%s3016_s1 + $0x380] sm:$0xff]   ;;  %v2367_v54 = vld [vmem:[%s3016_s1 + $0x348] sm:$0xff]  }
  0x32   :  { %2064 = vmatprep.subr.bf16.mxu1 %v2308_v55  ;;  %v2368_v55 = vld [vmem:[%s3016_s1 + $0x3c8] sm:$0xff]  }
  0x34   :  { %2043 = vmatpush3.bf16.msra.mxu0 %v2309_v56  ;;  %v2369_v56 = vld [vmem:[%s3016_s1 + $0x308] sm:$0xff]  }
  0x35   :  { %2065 = vmatpush3.bf16.msra.mxu1 %v2310_v57  ;;  %2044 = vmatprep.subr.bf16.mxu0 %v2311_v58  ;;  %v2370_v57 = vld [vmem:[%s3016_s1 + $0x388] sm:$0xff]   ;;  %v2371_v58 = vld [vmem:[%s3016_s1 + $0x350] sm:$0xff]  }
  0x36   :  { %2066 = vmatprep.subr.bf16.mxu1 %v2312_v59  ;;  %v2372_v59 = vld [vmem:[%s3016_s1 + $0x3d0] sm:$0xff]  }
  0x38   :  { %2045 = vmatpush3.bf16.msra.mxu0 %v2313_v60  ;;  %v2373_v60 = vld [vmem:[%s3016_s1 + $0x310] sm:$0xff]  }
  0x39   :  { %2067 = vmatpush3.bf16.msra.mxu1 %v2314_v61  ;;  %2046 = vmatprep.subr.bf16.mxu0 %v2315_v62  ;;  %v2374_v61 = vld [vmem:[%s3016_s1 + $0x390] sm:$0xff]   ;;  %v2375_v62 = vld [vmem:[%s3016_s1 + $0x358] sm:$0xff]  }
  0x3a   :  { %2068 = vmatprep.subr.bf16.mxu1 %v2316_v63  ;;  %v2376_v63 = vld [vmem:[%s3016_s1 + $0x3d8] sm:$0xff]  }
  0x3c   :  { %2047 = vmatpush3.bf16.msra.mxu0 %v2317_v0  ;;  %v2377_v0 = vld [vmem:[%s3016_s1 + $0x318] sm:$0xff]  }
  0x3d   :  { %2069 = vmatpush3.bf16.msra.mxu1 %v2318_v1  ;;  %2048 = vmatprep.subr.bf16.mxu0 %v2319_v2  ;;  %v2378_v1 = vld [vmem:[%s3016_s1 + $0x398] sm:$0xff]   ;;  %v2379_v2 = vld [vmem:[%s3016_s1 + $0x360] sm:$0xff]  }
  0x3e   :  { %2070 = vmatprep.subr.bf16.mxu1 %v2320_v3  ;;  %v2380_v3 = vld [vmem:[%s3016_s1 + $0x3e0] sm:$0xff]  }
  0x40   :  { %2049 = vmatpush3.bf16.msra.mxu0 %v2321_v4  ;;  %v2381_v4 = vld [vmem:[%s3016_s1 + $0x320] sm:$0xff]  }
  0x41   :  { %2071 = vmatpush3.bf16.msra.mxu1 %v2322_v5  ;;  %2078 = vmatprep.subr.bf16.mxu0 %v2327_v12  ;;  %v2382_v5 = vld [vmem:[%s3016_s1 + $0x3a0] sm:$0xff]   ;;  %v2389_v12 = vld [vmem:[%s3016_s1 + $0x330] sm:$0xff]  }
  0x42   :  { %2100 = vmatprep.subr.bf16.mxu1 %v2328_v13  ;;  %v2390_v13 = vld [vmem:[%s3016_s1 + $0x3b0] sm:$0xff]  }
  0x43   :  { %1247 = vmatmul.mubr.bf16.vlgmr.msra.gmra.mrb[4].mxu0 %v1821_v7  ;;  %v2384_v7 = vld [vmem:[%s3016_s1 + $0x3e8] sm:$0xff]  }
  0x44   :  { %1287 = vmatmul.mubr.bf16.vlgmr.msra.gmra.mrb[4].mxu1 %v1823_v10  ;;  %2079 = vmatpush3.bf16.msra.mxu0 %v2329_v14  ;;  %v2387_v10 = vld [vmem:[%s3016_s1 + $0x370] sm:$0xff]   ;;  %v2391_v14 = vld [vmem:[%s3016_s1 + $0x378] sm:$0xff]  }
  0x45   :  { %2101 = vmatpush3.bf16.msra.mxu1 %v2330_v15  ;;  %2080 = vmatprep.subr.bf16.mxu0 %v2331_v16  ;;  %v2392_v15 = vld [vmem:[%s3016_s1 + $0x3f8] sm:$0xff]  }
  0x46   :  { %2102 = vmatprep.subr.bf16.mxu1 %v2332_v17  ;;  %1326 = vmatprep.mubr.bf16.mxu0 %v1826_v47  ;;  %v2393_v16 = vld [vmem:[%s3016_s1 + $0x338] sm:$0xff]   ;;  %v2412_v47 = vld [vmem:[%s3019_s7 + $0x28] sm:$0xff]  }
  0x47   :  { %1366 = vmatprep.mubr.bf16.mxu1 %v1828_v49  ;;  %v2394_v17 = vld [vmem:[%s3016_s1 + $0x3b8] sm:$0xff]  }
  0x48   :  { %2081 = vmatpush3.bf16.msra.mxu0 %v2333_v18  ;;  %v45_v18 = vld [vmem:[%s3017_s0 + $0x30] sm:$0xff] }
  0x49   :  { %2103 = vmatpush3.bf16.msra.mxu1 %v2334_v19  ;;  %2082 = vmatprep.subr.bf16.mxu0 %v2335_v20  ;;  %v46_v19 = vld [vmem:[%s3017_s0 + $0x38] sm:$0xff]  ;;  %v1829_v20 = vcombine.low %v45_v18, %v45_v18 }
  0x4a   :  { %2104 = vmatprep.subr.bf16.mxu1 %v2336_v21  ;;  %v1830_v21 = vcombine.high %v45_v18, %v45_v18 }
  0x4c   :  { %2083 = vmatpush3.bf16.msra.mxu0 %v2337_v22  ;;  %v1831_v22 = vcombine.low %v46_v19, %v46_v19 }
  0x4d   :  { %2105 = vmatpush3.bf16.msra.mxu1 %v2338_v23  ;;  %2084 = vmatprep.subr.bf16.mxu0 %v2339_v24  ;;  %v1832_v23 = vcombine.high %v46_v19, %v46_v19  ;;  %v2423_v24 = vmov 0.0  }
  0x4e   :  { %2106 = vmatprep.subr.bf16.mxu1 %v2340_v25  ;;  %v2399_v25 = vld [vmem:[%s3018_s4] sm:$0xff]  }
  0x50   :  { %2085 = vmatpush3.bf16.msra.mxu0 %v2341_v26  ;;  %v2400_v26 = vld [vmem:[%s3018_s4 + $0x8] sm:$0xff]  }
  0x51   :  { %2107 = vmatpush3.bf16.msra.mxu1 %v2342_v27  ;;  %2086 = vmatprep.subr.bf16.mxu0 %v2343_v28  ;;  %v2401_v27 = vld [vmem:[%s3018_s4 + $0x10] sm:$0xff]   ;;  %v2402_v28 = vld [vmem:[%s3018_s4 + $0x18] sm:$0xff]  }
  0x52   :  { %2108 = vmatprep.subr.bf16.mxu1 %v2344_v29  ;;  %v2403_v29 = vld [vmem:[%s3018_s4 + $0x20] sm:$0xff]  }
  0x54   :  { %2087 = vmatpush3.bf16.msra.mxu0 %v2345_v30  ;;  %v2404_v30 = vld [vmem:[%s3018_s4 + $0x28] sm:$0xff]  }
  0x55   :  { %2109 = vmatpush3.bf16.msra.mxu1 %v2346_v31  ;;  %2088 = vmatprep.subr.bf16.mxu0 %v2347_v32  ;;  %v2405_v31 = vld [vmem:[%s3018_s4 + $0x30] sm:$0xff]   ;;  %v2406_v32 = vld [vmem:[%s3018_s4 + $0x38] sm:$0xff]  }
  0x56   :  { %2110 = vmatprep.subr.bf16.mxu1 %v2348_v33  ;;  %v2407_v33 = vld [vmem:[%s3019_s7] sm:$0xff]  }
  0x58   :  { %2089 = vmatpush3.bf16.msra.mxu0 %v2349_v34  ;;  %v2408_v34 = vld [vmem:[%s3019_s7 + $0x8] sm:$0xff]  }
  0x59   :  { %2111 = vmatpush3.bf16.msra.mxu1 %v2350_v35  ;;  %2090 = vmatprep.subr.bf16.mxu0 %v2351_v36  ;;  %v2409_v35 = vld [vmem:[%s3019_s7 + $0x10] sm:$0xff]   ;;  %v2410_v36 = vld [vmem:[%s3019_s7 + $0x18] sm:$0xff]  }
  0x5a   :  { %2112 = vmatprep.subr.bf16.mxu1 %v2352_v37  ;;  %v2411_v37 = vld [vmem:[%s3019_s7 + $0x20] sm:$0xff]  }
  0x5c   :  { %2091 = vmatpush3.bf16.msra.mxu0 %v2353_v38 }
  0x5d   :  { %2113 = vmatpush3.bf16.msra.mxu1 %v2354_v39  ;;  %2092 = vmatprep.subr.bf16.mxu0 %v2355_v40  ;;  %v1816_v40 = vld [vmem:[%s3020_s2] ss:$0 sm:$0xff] }
  0x5e   :  { %2114 = vmatprep.subr.bf16.mxu1 %v2356_v41 }
  0x60   :  { %2093 = vmatpush3.bf16.msra.mxu0 %v2357_v42 }
  0x61   :  { %2115 = vmatpush3.bf16.msra.mxu1 %v2358_v43  ;;  %2122 = vmatprep.subr.bf16.mxu0 %v2363_v50 }
  0x62   :  { %2144 = vmatprep.subr.bf16.mxu1 %v2364_v51 }
  0x63   :  { %1327 = vmatmul.mubr.bf16.vlgmr.msra.gmra.mrb[8].mxu0 %v1825_v46 }
  0x64   :  { %1367 = vmatmul.mubr.bf16.vlgmr.msra.gmra.mrb[8].mxu1 %v1827_v48  ;;  %2123 = vmatpush3.bf16.msra.mxu0 %v2365_v52 }
  0x65   :  { %2145 = vmatpush3.bf16.msra.mxu1 %v2366_v53  ;;  %2124 = vmatprep.subr.bf16.mxu0 %v2367_v54 }
  0x66   :  { %2146 = vmatprep.subr.bf16.mxu1 %v2368_v55  ;;  %1406 = vmatprep.mubr.bf16.mxu0 %v1830_v21 }
  0x67   :  { %1446 = vmatprep.mubr.bf16.mxu1 %v1832_v23  ;;  %v1961_v23 = vld [vmem:[%s3021_s3] ss:$0 sm:$0xff] }
  0x68   :  { %2125 = vmatpush3.bf16.msra.mxu0 %v2369_v56 }
  0x69   :  { %2147 = vmatpush3.bf16.msra.mxu1 %v2370_v57  ;;  %2126 = vmatprep.subr.bf16.mxu0 %v2371_v58 }
  0x6a   :  { %2148 = vmatprep.subr.bf16.mxu1 %v2372_v59 }
  0x6c   :  { %2127 = vmatpush3.bf16.msra.mxu0 %v2373_v60 }
  0x6d   :  { %2149 = vmatpush3.bf16.msra.mxu1 %v2374_v61  ;;  %2128 = vmatprep.subr.bf16.mxu0 %v2375_v62 }
  0x6e   :  { %2150 = vmatprep.subr.bf16.mxu1 %v2376_v63 }
  0x70   :  { %2129 = vmatpush3.bf16.msra.mxu0 %v2377_v0 }
  0x71   :  { %2151 = vmatpush3.bf16.msra.mxu1 %v2378_v1  ;;  %2130 = vmatprep.subr.bf16.mxu0 %v2379_v2 }
  0x72   :  { %2152 = vmatprep.subr.bf16.mxu1 %v2380_v3 }
  0x74   :  { %2131 = vmatpush3.bf16.msra.mxu0 %v2381_v4 }
  0x75   :  { %2153 = vmatpush3.bf16.msra.mxu1 %v2382_v5  ;;  %2132 = vmatprep.subr.bf16.mxu0 %v2383_v6 }
  0x76   :  { %2154 = vmatprep.subr.bf16.mxu1 %v2384_v7 }
  0x78   :  { %2133 = vmatpush3.bf16.msra.mxu0 %v2385_v8 }
  0x79   :  { %2155 = vmatpush3.bf16.msra.mxu1 %v2386_v9  ;;  %2134 = vmatprep.subr.bf16.mxu0 %v2387_v10 }
  0x7a   :  { %2156 = vmatprep.subr.bf16.mxu1 %v2388_v11 }
  0x7c   :  { %2135 = vmatpush3.bf16.msra.mxu0 %v2389_v12 }
  0x7d   :  { %2157 = vmatpush3.bf16.msra.mxu1 %v2390_v13  ;;  %2136 = vmatprep.subr.bf16.mxu0 %v2391_v14 }
  0x7e   :  { %2158 = vmatprep.subr.bf16.mxu1 %v2392_v15 }
  0x80   :  { %2137 = vmatpush3.bf16.msra.mxu0 %v2393_v16 }
  0x81   :  { %2159 = vmatpush3.bf16.msra.mxu1 %v2394_v17  ;;  %2193 = vmatprep.subr.bf16.mxu0 %v2423_v24 }
  0x82   :  { %2213 = vmatprep.subr.bf16.mxu1 %v2423_v24 }
  0x83   :  { %1407 = vmatmul.mubr.bf16.vlgmr.msra.gmra.mrb[12].mxu0 %v1829_v20 }
  0x84   :  { %1447 = vmatmul.mubr.bf16.vlgmr.msra.gmra.mrb[12].mxu1 %v1831_v22  ;;  %2194 = vmatpush3.bf16.msra.mxu0 %v2399_v25 }
  0x85   :  { %2195 = vmatprep.subr.bf16.mxu0 %v2423_v24  ;;  %2209 = vmatprep.mubr.msk.bf16.mxu0 %vm2424_vm0, %v2423_v24 }
  0x86   :  { %2229 = vmatprep.mubr.msk.bf16.mxu1 %vm2424_vm0, %v2423_v24  ;;  %2214 = vmatpush3.bf16.msra.mxu1 %v2407_v33  ;;  %v2417_v33 = vld [vmem:[%s3022_s9 + $0x10] sm:$0xff]  }
  0x87   :  { %2215 = vmatprep.subr.bf16.mxu1 %v2423_v24 }
  0x88   :  { %2196 = vmatpush3.bf16.msra.mxu0 %v2400_v26 }
  0x89   :  { %2197 = vmatprep.subr.bf16.mxu0 %v2423_v24 }
  0x8a   :  { %2216 = vmatpush3.bf16.msra.mxu1 %v2408_v34  ;;  %v2418_v34 = vld [vmem:[%s3022_s9 + $0x18] sm:$0xff]  }
  0x8b   :  { %2217 = vmatprep.subr.bf16.mxu1 %v2423_v24 }
  0x8c   :  { %2198 = vmatpush3.bf16.msra.mxu0 %v2401_v27 }
  0x8d   :  { %2199 = vmatprep.subr.bf16.mxu0 %v2423_v24 }
  0x8e   :  { %2218 = vmatpush3.bf16.msra.mxu1 %v2409_v35  ;;  %v2419_v35 = vld [vmem:[%s3022_s9 + $0x20] sm:$0xff]  }
  0x8f   :  { %2219 = vmatprep.subr.bf16.mxu1 %v2423_v24 }
  0x90   :  { %2200 = vmatpush3.bf16.msra.mxu0 %v2402_v28 }
  0x91   :  { %2201 = vmatprep.subr.bf16.mxu0 %v2423_v24 }
  0x92   :  { %2220 = vmatpush3.bf16.msra.mxu1 %v2410_v36  ;;  %v2420_v36 = vld [vmem:[%s3022_s9 + $0x28] sm:$0xff]  }
  0x93   :  { %2221 = vmatprep.subr.bf16.mxu1 %v2423_v24 }
  0x94   :  { %2202 = vmatpush3.bf16.msra.mxu0 %v2403_v29  ;;  %v2413_v29 = vld [vmem:[%s3019_s7 + $0x30] sm:$0xff]  }
  0x95   :  { %2203 = vmatprep.subr.bf16.mxu0 %v2423_v24 }
  0x96   :  { %2222 = vmatpush3.bf16.msra.mxu1 %v2411_v37  ;;  %v1962_v37 = vld [vmem:[%s3023_s5] ss:$0 sm:$0xff] }
  0x97   :  { %2223 = vmatprep.subr.bf16.mxu1 %v2423_v24 }
  0x98   :  { %2204 = vmatpush3.bf16.msra.mxu0 %v2404_v30  ;;  %v2414_v30 = vld [vmem:[%s3019_s7 + $0x38] sm:$0xff]  }
  0x99   :  { %2205 = vmatprep.subr.bf16.mxu0 %v2423_v24 }
  0x9a   :  { %2224 = vmatpush3.bf16.msra.mxu1 %v2412_v47  ;;  %v2421_v47 = vld [vmem:[%s3022_s9 + $0x30] sm:$0xff]  }
  0x9b   :  { %2225 = vmatprep.subr.bf16.mxu1 %v2423_v24 }
  0x9c   :  { %2206 = vmatpush3.bf16.msra.mxu0 %v2405_v31  ;;  %v2415_v31 = vld [vmem:[%s3022_s9] sm:$0xff]  }
  0x9d   :  { %2207 = vmatprep.subr.bf16.mxu0 %v2423_v24 }
  0x9e   :  { %2226 = vmatpush3.bf16.msra.mxu1 %v2413_v29 }
  0x9f   :  { %2227 = vmatprep.subr.bf16.mxu1 %v2423_v24 }
  0xa0   :  { %2208 = vmatpush3.bf16.msra.mxu0 %v2406_v32  ;;  %v2416_v32 = vld [vmem:[%s3022_s9 + $0x8] sm:$0xff]  }
  0xa1   :  { %2233 = vmatprep.subr.bf16.mxu0 %v2423_v24 }
  0xa2   :  { %2228 = vmatpush3.bf16.msra.mxu1 %v2414_v30 }
  0xf6   :  { %v2006_v38 = vpop.f32.mrb[0].mxu0 }
  0xf7   :  { %v2028_v39 = vpop.f32.mrb[0].mxu1  ;;  %v2007_v41 = vpop.f32.mrb[1].mxu0 }
  0xf8   :  { %v2029_v42 = vpop.f32.mrb[1].mxu1  ;;  %v2008_v43 = vadd.f32 %v2007_v41, %v2006_v38  ;;  %v2009_v45 = vpop.f32.mrb[2].mxu0 }
  0xf9   :  { %v2030_v44 = vadd.f32 %v2029_v42, %v2028_v39  ;;  %v2031_v46 = vpop.f32.mrb[2].mxu1  ;;  %v2010_v48 = vpop.f32.mrb[3].mxu0  ;;  %v1971_v39 = vld [vmem:[%s3024_s6] ss:$0 sm:$0xff] }
  0xfa   :  { %v2032_v49 = vpop.f32.mrb[3].mxu1  ;;  %v1169_v50 = vadd.f32 %v2008_v43, %v1816_v40  ;;  %v2422_v48 = vld [vmem:[%s3022_s9 + $0x38] sm:$0xff]  }
  0xfb   :  { %v1972_v49 = vld [vmem:[%s3025_s8] ss:$0 sm:$0xff] }
  0xfc   :  { %v1209_v51 = vadd.f32 %v2030_v44, %v1169_v50 }
 0x116   :  { %v2050_v52 = vpop.f32.mrb[4].mxu0 }
 0x117   :  { %v2072_v53 = vpop.f32.mrb[4].mxu1  ;;  %v2051_v54 = vpop.f32.mrb[5].mxu0 }
 0x118   :  { %v2073_v55 = vpop.f32.mrb[5].mxu1  ;;  %v2052_v56 = vadd.f32 %v2051_v54, %v2050_v52  ;;  %v2053_v58 = vpop.f32.mrb[6].mxu0 }
 0x119   :  { %v2074_v57 = vadd.f32 %v2073_v55, %v2072_v53  ;;  %v2075_v59 = vpop.f32.mrb[6].mxu1  ;;  %v2054_v60 = vpop.f32.mrb[7].mxu0 }
 0x11a   :  { %v2076_v61 = vpop.f32.mrb[7].mxu1  ;;  %v1249_v62 = vadd.f32 %v2052_v56, %v1209_v51 }
 0x11c   :  { %v1289_v63 = vadd.f32 %v2074_v57, %v1249_v62 }
 0x136   :  { %v2094_v0 = vpop.f32.mrb[8].mxu0 }
 0x137   :  { %v2116_v1 = vpop.f32.mrb[8].mxu1  ;;  %v2095_v2 = vpop.f32.mrb[9].mxu0 }
 0x138   :  { %v2096_v3 = vadd.f32 %v2095_v2, %v2094_v0  ;;  %v2117_v4 = vpop.f32.mrb[9].mxu1  ;;  %v2097_v5 = vpop.f32.mrb[10].mxu0 }
 0x139   :  { %v2118_v6 = vadd.f32 %v2117_v4, %v2116_v1  ;;  %v2119_v7 = vpop.f32.mrb[10].mxu1  ;;  %v2098_v8 = vpop.f32.mrb[11].mxu0 }
 0x13a   :  { %v1329_v9 = vadd.f32 %v2096_v3, %v1289_v63  ;;  %v2120_v10 = vpop.f32.mrb[11].mxu1 }
 0x13c   :  { %v1369_v11 = vadd.f32 %v2118_v6, %v1329_v9 }
 0x156   :  { %v2138_v12 = vpop.f32.mrb[12].mxu0 }
 0x157   :  { %v2160_v13 = vpop.f32.mrb[12].mxu1  ;;  %v2139_v14 = vpop.f32.mrb[13].mxu0 }
 0x158   :  { %v2140_v15 = vadd.f32 %v2139_v14, %v2138_v12  ;;  %v2161_v16 = vpop.f32.mrb[13].mxu1  ;;  %v2141_v17 = vpop.f32.mrb[14].mxu0 }
 0x159   :  { %v2162_v18 = vadd.f32 %v2161_v16, %v2160_v13  ;;  %v2163_v19 = vpop.f32.mrb[14].mxu1  ;;  %v2142_v20 = vpop.f32.mrb[15].mxu0 }
 0x15a   :  { %v1409_v21 = vadd.f32 %v2140_v15, %v1369_v11  ;;  %v2164_v22 = vpop.f32.mrb[15].mxu1 }
 0x15c   :  { %v1449_v25 = vadd.f32 %v2162_v18, %v1409_v21 }
 0x15e   :  { %vm1454_vm1 = vcmp.ge.f32.partialorder %v1449_v25, 0.0  ;;  %v1462_v26 = vmul.f32 %v1961_v23, %v1449_v25 }
 0x160   :  { %v1463_v27 = vsel %vm1454_vm1, %v1449_v25, %v1462_v26 }
 0x161   :  { %v1464_v28 = vpack.c.bf16 %v1463_v27, %v1463_v27 }
 0x163   :  { %2210 = vmatmul.mubr.bf16.vlgmr.msra.gmra.mrb[16].mxu0 %v1464_v28 }
 0x164   :  { %2249 = vmatprep.mubr.msk.bf16.mxu0 %vm2424_vm0, %v2423_v24  ;;  %2234 = vmatpush3.bf16.msra.mxu0 %v2415_v31 }
 0x165   :  { %2235 = vmatprep.subr.bf16.mxu0 %v2423_v24 }
 0x168   :  { %2236 = vmatpush3.bf16.msra.mxu0 %v2416_v32 }
 0x169   :  { %2237 = vmatprep.subr.bf16.mxu0 %v2423_v24 }
 0x16c   :  { %2238 = vmatpush3.bf16.msra.mxu0 %v2417_v33 }
 0x16d   :  { %2239 = vmatprep.subr.bf16.mxu0 %v2423_v24 }
 0x170   :  { %2240 = vmatpush3.bf16.msra.mxu0 %v2418_v34 }
 0x171   :  { %2241 = vmatprep.subr.bf16.mxu0 %v2423_v24 }
 0x174   :  { %2242 = vmatpush3.bf16.msra.mxu0 %v2419_v35 }
 0x175   :  { %2243 = vmatprep.subr.bf16.mxu0 %v2423_v24 }
 0x178   :  { %2244 = vmatpush3.bf16.msra.mxu0 %v2420_v36 }
 0x179   :  { %2245 = vmatprep.subr.bf16.mxu0 %v2423_v24 }
 0x17c   :  { %2246 = vmatpush3.bf16.msra.mxu0 %v2421_v47 }
 0x17d   :  { %2247 = vmatprep.subr.bf16.mxu0 %v2423_v24  ;;  %v1981_v24 = vld [vmem:[%s3026_s10] ss:$0 sm:$0xff] }
 0x180   :  { %2248 = vmatpush3.bf16.msra.mxu0 %v2422_v48 }
 0x236   :  { %v1570_v38 = vpop.f32.mrb[16].mxu0 }
 0x237   :  { %v1571_v40 = vadd.f32 %v1962_v37, %v1570_v38  ;;  %v2211_v41 = vpop.f32.mrb[17].mxu0 }
 0x238   :  { %v1573_v42 = vpop.f32.mrb[18].mxu0 }
 0x239   :  { %vm1576_vm2 = vcmp.ge.f32.partialorder %v1571_v40, 0.0  ;;  %v1584_v43 = vmul.f32 %v1971_v39, %v1571_v40  ;;  %v2212_v44 = vpop.f32.mrb[19].mxu0 }
 0x23b   :  { %v1585_v45 = vsel %vm1576_vm2, %v1571_v40, %v1584_v43 }
 0x23c   :  { %v1586_v46 = vpack.c.bf16 %v1585_v45, %v1585_v45 }
 0x23e   :  { %2230 = vmatmul.mubr.bf16.vlgmr.msra.gmra.mrb[16].mxu1 %v1586_v46 }
 0x311   :  { %v1692_v50 = vpop.f32.mrb[16].mxu1 }
 0x312   :  { %v1693_v51 = vadd.f32 %v1972_v49, %v1692_v50  ;;  %v2231_v52 = vpop.f32.mrb[17].mxu1 }
 0x313   :  { %v1695_v53 = vpop.f32.mrb[18].mxu1 }
 0x314   :  { %v1698_v54 = vadd.f32 %v1693_v51, %v1463_v27  ;;  %v2232_v55 = vpop.f32.mrb[19].mxu1 }
 0x316   :  { %v1699_v56 = vpack.c.bf16 %v1698_v54, %v1698_v54 }
 0x318   :  { %2250 = vmatmul.mubr.bf16.vlgmr.msra.gmra.mrb[20].mxu0 %v1699_v56 }
 0x3eb   :  { %v1805_v57 = vpop.f32.mrb[20].mxu0 }
 0x3ec   :  { %v1806_v58 = vadd.f32 %v1981_v24, %v1805_v57  ;;  %v2251_v59 = vpop.f32.mrb[21].mxu0 }
 0x3ed   :  { %v1808_v60 = vpop.f32.mrb[22].mxu0 }
 0x3ee   :  { %1811 = vst [vmem:[%s3027_s11] sm:$0xff] %v1806_v58  ;;  %v2252_v61 = vpop.f32.mrb[23].mxu0 }

</bundles_post_ra>
